<compile_context>
chip_gen: v5e
topology: v5e:2x2
jax: 0.10.0
libtpu: 0.0.40
codegen_flags: <defaults>
</compile_context>

<pallas_src>
import math

import jax
import jax.numpy as jnp
from jax.experimental import pallas as pl
from jax.experimental.pallas import tpu as pltpu


# ----------------------------------------------------------------------------
# Pallas kernel: fused bi-LSTM -> linear emissions -> CRF negative log-likelihood
# One batch tile of TB examples per grid step; rows are time-major: row = t*TB + b.
# ----------------------------------------------------------------------------
def _lstm_crf_kernel(emb_ref, w_ih_ref, b_ih_ref, w_hh_ref, w_out_ref, b_out_ref,
                     start_ref, end_ref, trans_ref, exp_trans_ref, c_col_ref,
                     sel_ref, tags_oh_ref, last_oh_ref, mask_ref,
                     nll_ref, h_scr):
    emb = emb_ref[0]               # (T*TB, E)
    tags_oh = tags_oh_ref[0]       # (T*TB, K)
    last_oh = last_oh_ref[0]       # (TB, K)
    mask_tm = mask_ref[0]          # (T*TB, 1)  time-major {0,1}
    sel = sel_ref[...]             # (TB, T*TB) selector: sel[b, t*TB + b] = 1

    w_ih = w_ih_ref[...]           # (E, 8H)   cols [I_f I_b | F_f F_b | O_f O_b | G_f G_b]
    b_ih = b_ih_ref[...]           # (1, 8H)
    w_hh = w_hh_ref[...]           # (2H, 8H)  block-diag: rows 0:H -> fwd cols, H:2H -> bwd cols
    w_out = w_out_ref[...]         # (2H, K)
    b_out = b_out_ref[...]         # (1, K)
    start = start_ref[...]         # (1, K)
    end = end_ref[...]             # (1, K)
    trans = trans_ref[...]         # (K, K)
    exp_trans = exp_trans_ref[...]  # (K, K) = exp(trans - c_col)
    c_col = c_col_ref[...]         # (1, K)

    TB, TTB = sel.shape
    T = TTB // TB
    H2 = w_hh.shape[0]             # 2H
    H = H2 // 2
    H8 = 8 * H

    # ---- 1. Input projection for BOTH directions, hoisted out of the recurrence:
    #         one lane-dense (T*TB, E) @ (E, 8H) matmul (+ bias broadcast).
    gates_in = jnp.dot(emb, w_ih, preferred_element_type=jnp.float32) + b_ih   # (T*TB, 8H)

    # Column-direction mask: within each 2H gate group, first H columns are the fwd direction.
    col = jax.lax.broadcasted_iota(jnp.int32, (1, H8), 1)
    fwd_cols = (col % H2) < H                                                  # (1, 8H) bool

    # ---- 2. Fused bi-LSTM recurrence: one block-diagonal matmul per serial step.
    h = jnp.zeros((TB, H2), jnp.float32)       # [h_f | h_b]
    c = jnp.zeros((TB, H2), jnp.float32)       # [c_f | c_b]
    for t in range(T):                         # static unroll (T small); fori_loop for large T
        rf = t * TB                            # forward direction processes time t
        rb = (T - 1 - t) * TB                  # backward direction processes time T-1-t
        gi = jnp.where(fwd_cols, gates_in[rf:rf + TB, :], gates_in[rb:rb + TB, :])
        gates = gi + jnp.dot(h, w_hh, preferred_element_type=jnp.float32)      # (TB, 8H)
        sig = jax.nn.sigmoid(gates[:, 0:3 * H2])       # [i | f | o] for both dirs: one wide push
        g = jnp.tanh(gates[:, 3 * H2:4 * H2])          # [g] for both dirs
        i = sig[:, 0:H2]
        f = sig[:, H2:2 * H2]
        o = sig[:, 2 * H2:3 * H2]
        c = f * c + i * g
        h = o * jnp.tanh(c)
        h_scr[rf:rf + TB, 0:H] = h[:, 0:H]             # forward state -> rows of time t
        h_scr[rb:rb + TB, H:H2] = h[:, H:H2]           # backward state -> rows of time T-1-t

    # ---- 3. hidden2tag: one matmul over all timesteps.
    emis = jnp.dot(h_scr[...], w_out, preferred_element_type=jnp.float32) + b_out   # (T*TB, K)

    # ---- 4. CRF gold-path score (torchcrf _compute_score), fully vectorized:
    #         bulk mask + selector matmul; no per-step serial adds.
    gold_mat = mask_tm * emis * tags_oh                                        # (T*TB, K)
    per_bk = (jnp.dot(sel, gold_mat, preferred_element_type=jnp.float32)
              + start * tags_oh[0:TB, :] + end * last_oh)                      # (TB, K)
    if T > 1:
        tr_mat = (jnp.dot(tags_oh[0:TTB - TB, :], trans,
                          preferred_element_type=jnp.float32)
                  * tags_oh[TB:, :] * mask_tm[TB:, :])                         # ((T-1)*TB, K)
        per_bk = per_bk + jnp.dot(sel[:, 0:TTB - TB], tr_mat,
                                  preferred_element_type=jnp.float32)
    gold = jnp.sum(per_bk, axis=1, keepdims=True)                              # (TB, 1)

    # ---- 5. CRF normalizer (forward algorithm), per-column-max exp-trans matmul form.
    alpha = start + emis[0:TB, :]                                              # (TB, K)
    for t in range(1, T):
        r = t * TB
        m = jnp.max(alpha, axis=1, keepdims=True)                              # (TB, 1)
        s = jnp.dot(jnp.exp(alpha - m), exp_trans,
                    preferred_element_type=jnp.float32)                        # (TB, K)
        nxt = emis[r:r + TB, :] + m + c_col + jnp.log(s)
        alpha = jnp.where(mask_tm[r:r + TB, :] > 0.5, nxt, alpha)
    alpha = alpha + end
    m = jnp.max(alpha, axis=1, keepdims=True)
    logz = m + jnp.log(jnp.sum(jnp.exp(alpha - m), axis=1, keepdims=True))     # (TB, 1)

    nll_col = logz - gold                                                      # (TB, 1)

    # ---- 6. Lane-dense output row: place nll[b] at lane b (diag select + sublane reduce).
    rid = jax.lax.broadcasted_iota(jnp.int32, (TB, TB), 0)
    cid = jax.lax.broadcasted_iota(jnp.int32, (TB, TB), 1)
    nll_ref[0] = jnp.sum(jnp.where(rid == cid, nll_col, 0.0), axis=0, keepdims=True)  # (1, TB)


# ----------------------------------------------------------------------------
# Wrapper: embedding gather, one-hot tags, weight packing, layout plumbing, pallas_call
# ----------------------------------------------------------------------------
def lstm_crf_loss(params, sentence, tags, mask, *, batch_tile=None):
    embed = params["embed"]
    trans = params["trans"].astype(jnp.float32)
    K = trans.shape[0]
    H = params["w_hh_f"].shape[1]
    B, T = sentence.shape
    E = embed.shape[1]

    if batch_tile is None:
        # Full-sublane (multiple-of-8) batch tiles.  Default keeps the grid small (1-2 tiles),
        # which is best on single-TC v5e/v6e; on v7x choose batch_tile so the grid has >= 2
        # tiles (one per TensorCore).
        batch_tile = min(64, max(8, ((B + 1) // 2 + 7) // 8 * 8))
    TB = max(8, (batch_tile + 7) // 8 * 8)
    G = -(-B // TB)
    B_pad = G * TB

    emb = jnp.take(embed, sentence, axis=0).astype(jnp.float32)       # (B, T, E)
    tags_oh = jax.nn.one_hot(tags, K, dtype=jnp.float32)              # (B, T, K)
    mask_f = mask.astype(jnp.float32)                                 # (B, T)
    seq_ends = jnp.sum(mask.astype(jnp.int32), axis=1) - 1
    last_tags = tags[jnp.arange(B), seq_ends]
    last_oh = jax.nn.one_hot(last_tags, K, dtype=jnp.float32)         # (B, K)

    if B_pad != B:
        pad = B_pad - B
        emb = jnp.pad(emb, ((0, pad), (0, 0), (0, 0)))
        tags_oh = jnp.pad(tags_oh, ((0, pad), (0, 0), (0, 0)))
        last_oh = jnp.pad(last_oh, ((0, pad), (0, 0)))
        mask_f = jnp.pad(mask_f, ((0, pad), (0, 0)))

    # Batch tiles; rows inside a tile are time-major (row = t*TB + b_local).
    emb_tiles = emb.reshape(G, TB, T, E).transpose(0, 2, 1, 3).reshape(G, T * TB, E)
    tags_tiles = tags_oh.reshape(G, TB, T, K).transpose(0, 2, 1, 3).reshape(G, T * TB, K)
    last_tiles = last_oh.reshape(G, TB, K)
    mask_tiles = mask_f.reshape(G, TB, T).transpose(0, 2, 1).reshape(G, T * TB, 1)

    # ---- Weight packing (all grid-invariant work done once here).
    def split_gates(w):                     # columns in torch LSTM order [i, f, g, o]
        return w[:, 0:H], w[:, H:2 * H], w[:, 2 * H:3 * H], w[:, 3 * H:4 * H]

    i_f, f_f, g_f, o_f = split_gates(params["w_ih_f"].T)              # (E, H) each
    i_b, f_b, g_b, o_b = split_gates(params["w_ih_b"].T)
    # Packed gate-column order: [I_f I_b | F_f F_b | O_f O_b | G_f G_b]
    # -> sigmoid gates occupy cols 0:6H (contiguous), tanh gates cols 6H:8H.
    w_ih = jnp.concatenate([i_f, i_b, f_f, f_b, o_f, o_b, g_f, g_b], axis=1)   # (E, 8H)

    bi_f, bf_f, bg_f, bo_f = split_gates((params["b_ih_f"] + params["b_hh_f"]).reshape(1, -1))
    bi_b, bf_b, bg_b, bo_b = split_gates((params["b_ih_b"] + params["b_hh_b"]).reshape(1, -1))
    b_ih = jnp.concatenate([bi_f, bi_b, bf_f, bf_b, bo_f, bo_b, bg_f, bg_b], axis=1)  # (1, 8H)

    hi_f, hf_f, hg_f, ho_f = split_gates(params["w_hh_f"].T)          # (H, H) each
    hi_b, hf_b, hg_b, ho_b = split_gates(params["w_hh_b"].T)
    Z = jnp.zeros((H, H), jnp.float32)
    w_hh_blk = jnp.concatenate([
        jnp.concatenate([hi_f, Z, hf_f, Z, ho_f, Z, hg_f, Z], axis=1),   # rows 0:H  (h_f)
        jnp.concatenate([Z, hi_b, Z, hf_b, Z, ho_b, Z, hg_b], axis=1),   # rows H:2H (h_b)
    ], axis=0).astype(jnp.float32)                                        # (2H, 8H)

    w_out2 = params["w_out"].T.astype(jnp.float32)                     # (2H, K): [fwd H | bwd H]
    b_out = params["b_out"].reshape(1, -1)
    start = params["start"].reshape(1, -1)
    end = params["end"].reshape(1, -1)
    c_col = jnp.max(trans, axis=0, keepdims=True)                      # (1, K) per-column max
    exp_trans = jnp.exp(trans - c_col)                                 # (K, K)

    # Selector for the gold-path reduction: sel[b, t*TB + b] = 1.
    sel = (jnp.arange(T * TB)[None, :] % TB == jnp.arange(TB)[:, None]).astype(jnp.float32)

    whole = lambda a: pl.BlockSpec(a.shape, lambda g: (0,) * a.ndim)   # resident, no re-DMA
    tiled3 = lambda a: pl.BlockSpec((1,) + a.shape[1:], lambda g: (g, 0, 0))

    grid_spec = pltpu.PrefetchScalarGridSpec(
        num_scalar_prefetch=0,
        grid=(G,),
        in_specs=[
            tiled3(emb_tiles),
            whole(w_ih), whole(b_ih), whole(w_hh_blk),
            whole(w_out2), whole(b_out),
            whole(start), whole(end), whole(trans), whole(exp_trans), whole(c_col),
            whole(sel),
            tiled3(tags_tiles), tiled3(last_tiles), tiled3(mask_tiles),
        ],
        out_specs=pl.BlockSpec((1, 1, TB), lambda g: (g, 0, 0)),
        scratch_shapes=[pltpu.VMEM((T * TB, 2 * H), jnp.float32)],
    )

    nll = pl.pallas_call(
        _lstm_crf_kernel,
        out_shape=jax.ShapeDtypeStruct((G, 1, TB), jnp.float32),
        grid_spec=grid_spec,
        compiler_params=pltpu.CompilerParams(
            dimension_semantics=("parallel",),
            vmem_limit_bytes=32 * 1024 * 1024),
    )(emb_tiles, w_ih, b_ih, w_hh_blk, w_out2, b_out,
      start, end, trans, exp_trans, c_col, sel,
      tags_tiles, last_tiles, mask_tiles)

    return jnp.mean(nll.reshape(B_pad)[:B])


# ----------------------------------------------------------------------------
# Pure-JAX reference (same math, no Pallas) for a sanity check
# ----------------------------------------------------------------------------
def reference_loss(params, sentence, tags, mask):
    embed = params["embed"]
    K = params["trans"].shape[0]
    H = params["w_hh_f"].shape[1]

    emb = jnp.take(embed, sentence, axis=0).astype(jnp.float32)
    B, T, _ = emb.shape

    def run_lstm(w_ih, w_hh, b_ih, b_hh, reverse):
        h = jnp.zeros((B, H), jnp.float32)
        c = jnp.zeros((B, H), jnp.float32)
        outs = [None] * T
        order = range(T - 1, -1, -1) if reverse else range(T)
        for t in order:
            gates = emb[:, t, :] @ w_ih.T + h @ w_hh.T + b_ih + b_hh
            i = jax.nn.sigmoid(gates[:, 0:H])
            f = jax.nn.sigmoid(gates[:, H:2 * H])
            g = jnp.tanh(gates[:, 2 * H:3 * H])
            o = jax.nn.sigmoid(gates[:, 3 * H:4 * H])
            c = f * c + i * g
            h = o * jnp.tanh(c)
            outs[t] = h
        return jnp.stack(outs, axis=1)

    hf = run_lstm(params["w_ih_f"], params["w_hh_f"], params["b_ih_f"], params["b_hh_f"], False)
    hb = run_lstm(params["w_ih_b"], params["w_hh_b"], params["b_ih_b"], params["b_hh_b"], True)
    lstm_out = jnp.concatenate([hf, hb], axis=-1)                      # (B, T, 2H)
    emis = lstm_out @ params["w_out"].T + params["b_out"]              # (B, T, K)

    start, end, trans = params["start"], params["end"], params["trans"]
    mask_f = mask.astype(jnp.float32)

    # gold score
    score = start[tags[:, 0]] + emis[jnp.arange(B), 0, tags[:, 0]]
    for t in range(1, T):
        sc = trans[tags[:, t - 1], tags[:, t]] + emis[jnp.arange(B), t, tags[:, t]]
        score = score + sc * mask_f[:, t]
    seq_ends = jnp.sum(mask.astype(jnp.int32), axis=1) - 1
    last_tags = tags[jnp.arange(B), seq_ends]
    score = score + end[last_tags]

    # normalizer
    alpha = start[None, :] + emis[:, 0, :]
    for t in range(1, T):
        x3 = alpha[:, :, None] + trans[None, :, :] + emis[:, t, None, :]
        nxt = jax.scipy.special.logsumexp(x3, axis=1)
        alpha = jnp.where(mask_f[:, t:t + 1] > 0.5, nxt, alpha)
    logz = jax.scipy.special.logsumexp(alpha + end[None, :], axis=1)

    return jnp.mean(logz - score)


# ----------------------------------------------------------------------------
# Deterministic parameter init (shapes follow the PyTorch module's __init__)
# ----------------------------------------------------------------------------
def init_params(key, vocab_size, tag_size, embedding_dim, hidden_dim):
    H = hidden_dim // 2
    ks = jax.random.split(key, 16)
    s = 1.0 / math.sqrt(H)
    u = lambda k, shp, sc: jax.random.uniform(k, shp, jnp.float32, -sc, sc)
    return {
        "embed": jax.random.normal(ks[0], (vocab_size, embedding_dim), jnp.float32),
        "w_ih_f": u(ks[1], (4 * H, embedding_dim), s),
        "w_hh_f": u(ks[2], (4 * H, H), s),
        "b_ih_f": u(ks[3], (4 * H,), s),
        "b_hh_f": u(ks[4], (4 * H,), s),
        "w_ih_b": u(ks[5], (4 * H, embedding_dim), s),
        "w_hh_b": u(ks[6], (4 * H, H), s),
        "b_ih_b": u(ks[7], (4 * H,), s),
        "b_hh_b": u(ks[8], (4 * H,), s),
        "w_out": u(ks[9], (tag_size, hidden_dim), 1.0 / math.sqrt(hidden_dim)),
        "b_out": u(ks[10], (tag_size,), 1.0 / math.sqrt(hidden_dim)),
        "start": u(ks[11], (tag_size,), 0.1),
        "end": u(ks[12], (tag_size,), 0.1),
        "trans": u(ks[13], (tag_size, tag_size), 0.1),
    }


if __name__ == "__main__":
    # Small shapes: vocab 50, tags 6, embedding_dim=32, hidden_dim=32 (H=16 -> 8H=128 lanes).
    B, T = 2, 8
    VOCAB, TAGS = 50, 6
    EMB_DIM, HIDDEN_DIM = 32, 32

    key = jax.random.PRNGKey(0)
    kp, ks, kt = jax.random.split(key, 3)
    params = init_params(kp, VOCAB, TAGS, EMB_DIM, HIDDEN_DIM)

    sentence = jax.random.randint(ks, (B, T), 0, VOCAB, dtype=jnp.int32)
    tags = jax.random.randint(kt, (B, T), 0, TAGS, dtype=jnp.int32)
    lengths = jnp.array([T, 5], dtype=jnp.int32)
    mask = (jnp.arange(T)[None, :] < lengths[:, None])                  # (B, T) bool, mask[:,0] True

    loss = lstm_crf_loss(params, sentence, tags, mask)
    loss = jax.block_until_ready(loss)

    ref = jax.block_until_ready(reference_loss(params, sentence, tags, mask))
    assert jnp.isfinite(loss), "loss is not finite"
    assert abs(float(loss) - float(ref)) <= 1e-3 + 1e-4 * abs(float(ref)), (
        f"mismatch: pallas={float(loss)} ref={float(ref)}")

    print("KERNEL_OK")
</pallas_src>

<mosaic_0001>
module attributes {stable_mosaic.version = 11 : i64} {
  func.func @_lstm_crf_kernel(%arg0: i32, %arg1: memref<1x64x32xf32, #tpu.memory_space<vmem>>, %arg2: memref<32x128xf32, #tpu.memory_space<vmem>>, %arg3: memref<1x128xf32, #tpu.memory_space<vmem>>, %arg4: memref<32x128xf32, #tpu.memory_space<vmem>>, %arg5: memref<32x6xf32, #tpu.memory_space<vmem>>, %arg6: memref<1x6xf32, #tpu.memory_space<vmem>>, %arg7: memref<1x6xf32, #tpu.memory_space<vmem>>, %arg8: memref<1x6xf32, #tpu.memory_space<vmem>>, %arg9: memref<6x6xf32, #tpu.memory_space<vmem>>, %arg10: memref<6x6xf32, #tpu.memory_space<vmem>>, %arg11: memref<1x6xf32, #tpu.memory_space<vmem>>, %arg12: memref<8x64xf32, #tpu.memory_space<vmem>>, %arg13: memref<1x64x6xf32, #tpu.memory_space<vmem>>, %arg14: memref<1x8x6xf32, #tpu.memory_space<vmem>>, %arg15: memref<1x64x1xf32, #tpu.memory_space<vmem>>, %arg16: memref<1x1x8xf32, #tpu.memory_space<vmem>>, %arg17: memref<64x32xf32, #tpu.memory_space<vmem>>) attributes {dimension_semantics = [#tpu.dimension_semantics<parallel>], iteration_bounds = array<i64: 1>, scalar_prefetch = 0 : i64, scratch_operands = 1 : i64, tpu.core_type = #tpu.core_type<tc>, window_params = [{transform_indices = @transform_0, window_bounds = array<i64: 1, 64, 32>}, {pipeline_mode = #tpu.pipeline_mode<synchronous>, transform_indices = @transform_1, window_bounds = array<i64: 32, 128>}, {pipeline_mode = #tpu.pipeline_mode<synchronous>, transform_indices = @transform_2, window_bounds = array<i64: 1, 128>}, {pipeline_mode = #tpu.pipeline_mode<synchronous>, transform_indices = @transform_3, window_bounds = array<i64: 32, 128>}, {pipeline_mode = #tpu.pipeline_mode<synchronous>, transform_indices = @transform_4, window_bounds = array<i64: 32, 6>}, {pipeline_mode = #tpu.pipeline_mode<synchronous>, transform_indices = @transform_5, window_bounds = array<i64: 1, 6>}, {pipeline_mode = #tpu.pipeline_mode<synchronous>, transform_indices = @transform_6, window_bounds = array<i64: 1, 6>}, {pipeline_mode = #tpu.pipeline_mode<synchronous>, transform_indices = @transform_7, window_bounds = array<i64: 1, 6>}, {pipeline_mode = #tpu.pipeline_mode<synchronous>, transform_indices = @transform_8, window_bounds = array<i64: 6, 6>}, {pipeline_mode = #tpu.pipeline_mode<synchronous>, transform_indices = @transform_9, window_bounds = array<i64: 6, 6>}, {pipeline_mode = #tpu.pipeline_mode<synchronous>, transform_indices = @transform_10, window_bounds = array<i64: 1, 6>}, {pipeline_mode = #tpu.pipeline_mode<synchronous>, transform_indices = @transform_11, window_bounds = array<i64: 8, 64>}, {transform_indices = @transform_12, window_bounds = array<i64: 1, 64, 6>}, {transform_indices = @transform_13, window_bounds = array<i64: 1, 8, 6>}, {transform_indices = @transform_14, window_bounds = array<i64: 1, 64, 1>}, {transform_indices = @transform_15, window_bounds = array<i64: 1, 1, 8>}]} {
    %c0 = arith.constant 0 : index
    %c0_0 = arith.constant 0 : index
    %c0_1 = arith.constant 0 : index
    %0 = vector.load %arg1[%c0, %c0_0, %c0_1] : memref<1x64x32xf32, #tpu.memory_space<vmem>>, vector<1x64x32xf32>
    %1 = vector.shape_cast %0 : vector<1x64x32xf32> to vector<64x32xf32>
    %c0_2 = arith.constant 0 : index
    %c0_3 = arith.constant 0 : index
    %c0_4 = arith.constant 0 : index
    %2 = vector.load %arg13[%c0_2, %c0_3, %c0_4] : memref<1x64x6xf32, #tpu.memory_space<vmem>>, vector<1x64x6xf32>
    %3 = vector.shape_cast %2 : vector<1x64x6xf32> to vector<64x6xf32>
    %c0_5 = arith.constant 0 : index
    %c0_6 = arith.constant 0 : index
    %c0_7 = arith.constant 0 : index
    %4 = vector.load %arg14[%c0_5, %c0_6, %c0_7] : memref<1x8x6xf32, #tpu.memory_space<vmem>>, vector<1x8x6xf32>
    %5 = vector.shape_cast %4 : vector<1x8x6xf32> to vector<8x6xf32>
    %c0_8 = arith.constant 0 : index
    %c0_9 = arith.constant 0 : index
    %c0_10 = arith.constant 0 : index
    %6 = vector.load %arg15[%c0_8, %c0_9, %c0_10] : memref<1x64x1xf32, #tpu.memory_space<vmem>>, vector<1x64x1xf32>
    %7 = vector.shape_cast %6 : vector<1x64x1xf32> to vector<64x1xf32>
    %c0_11 = arith.constant 0 : index
    %c0_12 = arith.constant 0 : index
    %8 = vector.load %arg12[%c0_11, %c0_12] : memref<8x64xf32, #tpu.memory_space<vmem>>, vector<8x64xf32>
    %c0_13 = arith.constant 0 : index
    %c0_14 = arith.constant 0 : index
    %9 = vector.load %arg2[%c0_13, %c0_14] : memref<32x128xf32, #tpu.memory_space<vmem>>, vector<32x128xf32>
    %c0_15 = arith.constant 0 : index
    %c0_16 = arith.constant 0 : index
    %10 = vector.load %arg3[%c0_15, %c0_16] : memref<1x128xf32, #tpu.memory_space<vmem>>, vector<1x128xf32>
    %c0_17 = arith.constant 0 : index
    %c0_18 = arith.constant 0 : index
    %11 = vector.load %arg4[%c0_17, %c0_18] : memref<32x128xf32, #tpu.memory_space<vmem>>, vector<32x128xf32>
    %c0_19 = arith.constant 0 : index
    %c0_20 = arith.constant 0 : index
    %12 = vector.load %arg5[%c0_19, %c0_20] : memref<32x6xf32, #tpu.memory_space<vmem>>, vector<32x6xf32>
    %c0_21 = arith.constant 0 : index
    %c0_22 = arith.constant 0 : index
    %13 = vector.load %arg6[%c0_21, %c0_22] : memref<1x6xf32, #tpu.memory_space<vmem>>, vector<1x6xf32>
    %c0_23 = arith.constant 0 : index
    %c0_24 = arith.constant 0 : index
    %14 = vector.load %arg7[%c0_23, %c0_24] : memref<1x6xf32, #tpu.memory_space<vmem>>, vector<1x6xf32>
    %c0_25 = arith.constant 0 : index
    %c0_26 = arith.constant 0 : index
    %15 = vector.load %arg8[%c0_25, %c0_26] : memref<1x6xf32, #tpu.memory_space<vmem>>, vector<1x6xf32>
    %c0_27 = arith.constant 0 : index
    %c0_28 = arith.constant 0 : index
    %16 = vector.load %arg9[%c0_27, %c0_28] : memref<6x6xf32, #tpu.memory_space<vmem>>, vector<6x6xf32>
    %c0_29 = arith.constant 0 : index
    %c0_30 = arith.constant 0 : index
    %17 = vector.load %arg10[%c0_29, %c0_30] : memref<6x6xf32, #tpu.memory_space<vmem>>, vector<6x6xf32>
    %c0_31 = arith.constant 0 : index
    %c0_32 = arith.constant 0 : index
    %18 = vector.load %arg11[%c0_31, %c0_32] : memref<1x6xf32, #tpu.memory_space<vmem>>, vector<1x6xf32>
    %cst = arith.constant dense<0.000000e+00> : vector<64x128xf32>
    %19 = tpu.matmul %1, %9, %cst {dimension_numbers = #tpu.dot_dimension_numbers<[1], [0], [0], [1], [0, 0, 1, 1], [], []>} : vector<64x32xf32>, vector<32x128xf32>, vector<64x128xf32> -> vector<64x128xf32>
    %20 = vector.broadcast %10 : vector<1x128xf32> to vector<64x128xf32>
    %21 = arith.addf %19, %20 : vector<64x128xf32>
    %22 = tpu.iota {dimensions = array<i32: 1>} : vector<1x128xi32>
    %c32_i32 = arith.constant 32 : i32
    %c0_i32 = arith.constant 0 : i32
    %23 = arith.cmpi eq, %c32_i32, %c0_i32 : i32
    %c1_i32 = arith.constant 1 : i32
    %24 = arith.select %23, %c1_i32, %c32_i32 : i32
    %25 = vector.broadcast %24 : i32 to vector<1x128xi32>
    %26 = arith.remsi %22, %25 : vector<1x128xi32>
    %c0_i32_33 = arith.constant 0 : i32
    %27 = vector.broadcast %c0_i32_33 : i32 to vector<1x128xi32>
    %28 = arith.cmpi ne, %26, %27 : vector<1x128xi32>
    %c0_i32_34 = arith.constant 0 : i32
    %29 = vector.broadcast %c0_i32_34 : i32 to vector<1x128xi32>
    %30 = arith.cmpi slt, %26, %29 : vector<1x128xi32>
    %c0_i32_35 = arith.constant 0 : i32
    %31 = arith.cmpi slt, %24, %c0_i32_35 : i32
    %32 = vector.broadcast %31 : i1 to vector<1x128xi1>
    %33 = vector.broadcast %32 : vector<1x128xi1> to vector<1x128xi1>
    %34 = arith.xori %30, %33 : vector<1x128xi1>
    %35 = arith.andi %34, %28 : vector<1x128xi1>
    %36 = vector.broadcast %24 : i32 to vector<1x128xi32>
    %37 = arith.addi %26, %36 : vector<1x128xi32>
    %38 = arith.select %35, %37, %26 : vector<1x128xi1>, vector<1x128xi32>
    %c16_i32 = arith.constant 16 : i32
    %39 = vector.broadcast %c16_i32 : i32 to vector<1x128xi32>
    %40 = arith.cmpi slt, %38, %39 : vector<1x128xi32>
    %cst_36 = arith.constant 0.000000e+00 : f32
    %41 = vector.broadcast %cst_36 : f32 to vector<8x32xf32>
    %cst_37 = arith.constant 0.000000e+00 : f32
    %42 = vector.broadcast %cst_37 : f32 to vector<8x32xf32>
    %43 = vector.extract_strided_slice %21 {offsets = [0, 0], sizes = [8, 128], strides = [1, 1]} : vector<64x128xf32> to vector<8x128xf32>
    %44 = vector.extract_strided_slice %21 {offsets = [56, 0], sizes = [8, 128], strides = [1, 1]} : vector<64x128xf32> to vector<8x128xf32>
    %45 = vector.shape_cast %40 : vector<1x128xi1> to vector<1x128xi1>
    %46 = vector.broadcast %45 : vector<1x128xi1> to vector<8x128xi1>
    %47 = arith.select %46, %43, %44 : vector<8x128xi1>, vector<8x128xf32>
    %cst_38 = arith.constant dense<0.000000e+00> : vector<8x128xf32>
    %48 = tpu.matmul %41, %11, %cst_38 {dimension_numbers = #tpu.dot_dimension_numbers<[1], [0], [0], [1], [0, 0, 1, 1], [], []>} : vector<8x32xf32>, vector<32x128xf32>, vector<8x128xf32> -> vector<8x128xf32>
    %49 = arith.addf %47, %48 : vector<8x128xf32>
    %50 = vector.extract_strided_slice %49 {offsets = [0, 0], sizes = [8, 96], strides = [1, 1]} : vector<8x128xf32> to vector<8x96xf32>
    %51 = arith.negf %50 : vector<8x96xf32>
    %52 = math.exp %51 : vector<8x96xf32>
    %cst_39 = arith.constant 1.000000e+00 : f32
    %53 = vector.broadcast %cst_39 : f32 to vector<8x96xf32>
    %54 = arith.addf %53, %52 : vector<8x96xf32>
    %55 = arith.divf %53, %54 : vector<8x96xf32>
    %56 = vector.extract_strided_slice %49 {offsets = [0, 96], sizes = [8, 32], strides = [1, 1]} : vector<8x128xf32> to vector<8x32xf32>
    %57 = math.tanh %56 : vector<8x32xf32>
    %58 = vector.extract_strided_slice %55 {offsets = [0, 0], sizes = [8, 32], strides = [1, 1]} : vector<8x96xf32> to vector<8x32xf32>
    %59 = vector.extract_strided_slice %55 {offsets = [0, 32], sizes = [8, 32], strides = [1, 1]} : vector<8x96xf32> to vector<8x32xf32>
    %60 = vector.extract_strided_slice %55 {offsets = [0, 64], sizes = [8, 32], strides = [1, 1]} : vector<8x96xf32> to vector<8x32xf32>
    %61 = arith.mulf %59, %42 : vector<8x32xf32>
    %62 = arith.mulf %58, %57 : vector<8x32xf32>
    %63 = arith.addf %61, %62 : vector<8x32xf32>
    %64 = math.tanh %63 : vector<8x32xf32>
    %65 = arith.mulf %60, %64 : vector<8x32xf32>
    %66 = vector.extract_strided_slice %65 {offsets = [0, 0], sizes = [8, 16], strides = [1, 1]} : vector<8x32xf32> to vector<8x16xf32>
    %c0_40 = arith.constant 0 : index
    %c0_41 = arith.constant 0 : index
    %67 = vector.load %arg17[%c0_40, %c0_41] : memref<64x32xf32, #tpu.memory_space<vmem>>, vector<8x16xf32>
    tpu.vector_store %arg17[%c0_40, %c0_41], %66 {strides = array<i32>} : memref<64x32xf32, #tpu.memory_space<vmem>>, vector<8x16xf32>,
    %68 = vector.extract_strided_slice %65 {offsets = [0, 16], sizes = [8, 16], strides = [1, 1]} : vector<8x32xf32> to vector<8x16xf32>
    %c56 = arith.constant 56 : index
    %c16 = arith.constant 16 : index
    %69 = vector.load %arg17[%c56, %c16] : memref<64x32xf32, #tpu.memory_space<vmem>>, vector<8x16xf32>
    tpu.vector_store %arg17[%c56, %c16], %68 {strides = array<i32>} : memref<64x32xf32, #tpu.memory_space<vmem>>, vector<8x16xf32>,
    %70 = vector.extract_strided_slice %21 {offsets = [8, 0], sizes = [8, 128], strides = [1, 1]} : vector<64x128xf32> to vector<8x128xf32>
    %71 = vector.extract_strided_slice %21 {offsets = [48, 0], sizes = [8, 128], strides = [1, 1]} : vector<64x128xf32> to vector<8x128xf32>
    %72 = vector.shape_cast %40 : vector<1x128xi1> to vector<1x128xi1>
    %73 = vector.broadcast %72 : vector<1x128xi1> to vector<8x128xi1>
    %74 = arith.select %73, %70, %71 : vector<8x128xi1>, vector<8x128xf32>
    %cst_42 = arith.constant dense<0.000000e+00> : vector<8x128xf32>
    %75 = tpu.matmul %65, %11, %cst_42 {dimension_numbers = #tpu.dot_dimension_numbers<[1], [0], [0], [1], [0, 0, 1, 1], [], []>} : vector<8x32xf32>, vector<32x128xf32>, vector<8x128xf32> -> vector<8x128xf32>
    %76 = arith.addf %74, %75 : vector<8x128xf32>
    %77 = vector.extract_strided_slice %76 {offsets = [0, 0], sizes = [8, 96], strides = [1, 1]} : vector<8x128xf32> to vector<8x96xf32>
    %78 = arith.negf %77 : vector<8x96xf32>
    %79 = math.exp %78 : vector<8x96xf32>
    %cst_43 = arith.constant 1.000000e+00 : f32
    %80 = vector.broadcast %cst_43 : f32 to vector<8x96xf32>
    %81 = arith.addf %80, %79 : vector<8x96xf32>
    %82 = arith.divf %80, %81 : vector<8x96xf32>
    %83 = vector.extract_strided_slice %76 {offsets = [0, 96], sizes = [8, 32], strides = [1, 1]} : vector<8x128xf32> to vector<8x32xf32>
    %84 = math.tanh %83 : vector<8x32xf32>
    %85 = vector.extract_strided_slice %82 {offsets = [0, 0], sizes = [8, 32], strides = [1, 1]} : vector<8x96xf32> to vector<8x32xf32>
    %86 = vector.extract_strided_slice %82 {offsets = [0, 32], sizes = [8, 32], strides = [1, 1]} : vector<8x96xf32> to vector<8x32xf32>
    %87 = vector.extract_strided_slice %82 {offsets = [0, 64], sizes = [8, 32], strides = [1, 1]} : vector<8x96xf32> to vector<8x32xf32>
    %88 = arith.mulf %86, %63 : vector<8x32xf32>
    %89 = arith.mulf %85, %84 : vector<8x32xf32>
    %90 = arith.addf %88, %89 : vector<8x32xf32>
    %91 = math.tanh %90 : vector<8x32xf32>
    %92 = arith.mulf %87, %91 : vector<8x32xf32>
    %93 = vector.extract_strided_slice %92 {offsets = [0, 0], sizes = [8, 16], strides = [1, 1]} : vector<8x32xf32> to vector<8x16xf32>
    %c8 = arith.constant 8 : index
    %c0_44 = arith.constant 0 : index
    %94 = vector.load %arg17[%c8, %c0_44] : memref<64x32xf32, #tpu.memory_space<vmem>>, vector<8x16xf32>
    tpu.vector_store %arg17[%c8, %c0_44], %93 {strides = array<i32>} : memref<64x32xf32, #tpu.memory_space<vmem>>, vector<8x16xf32>,
    %95 = vector.extract_strided_slice %92 {offsets = [0, 16], sizes = [8, 16], strides = [1, 1]} : vector<8x32xf32> to vector<8x16xf32>
    %c48 = arith.constant 48 : index
    %c16_45 = arith.constant 16 : index
    %96 = vector.load %arg17[%c48, %c16_45] : memref<64x32xf32, #tpu.memory_space<vmem>>, vector<8x16xf32>
    tpu.vector_store %arg17[%c48, %c16_45], %95 {strides = array<i32>} : memref<64x32xf32, #tpu.memory_space<vmem>>, vector<8x16xf32>,
    %97 = vector.extract_strided_slice %21 {offsets = [16, 0], sizes = [8, 128], strides = [1, 1]} : vector<64x128xf32> to vector<8x128xf32>
    %98 = vector.extract_strided_slice %21 {offsets = [40, 0], sizes = [8, 128], strides = [1, 1]} : vector<64x128xf32> to vector<8x128xf32>
    %99 = vector.shape_cast %40 : vector<1x128xi1> to vector<1x128xi1>
    %100 = vector.broadcast %99 : vector<1x128xi1> to vector<8x128xi1>
    %101 = arith.select %100, %97, %98 : vector<8x128xi1>, vector<8x128xf32>
    %cst_46 = arith.constant dense<0.000000e+00> : vector<8x128xf32>
    %102 = tpu.matmul %92, %11, %cst_46 {dimension_numbers = #tpu.dot_dimension_numbers<[1], [0], [0], [1], [0, 0, 1, 1], [], []>} : vector<8x32xf32>, vector<32x128xf32>, vector<8x128xf32> -> vector<8x128xf32>
    %103 = arith.addf %101, %102 : vector<8x128xf32>
    %104 = vector.extract_strided_slice %103 {offsets = [0, 0], sizes = [8, 96], strides = [1, 1]} : vector<8x128xf32> to vector<8x96xf32>
    %105 = arith.negf %104 : vector<8x96xf32>
    %106 = math.exp %105 : vector<8x96xf32>
    %cst_47 = arith.constant 1.000000e+00 : f32
    %107 = vector.broadcast %cst_47 : f32 to vector<8x96xf32>
    %108 = arith.addf %107, %106 : vector<8x96xf32>
    %109 = arith.divf %107, %108 : vector<8x96xf32>
    %110 = vector.extract_strided_slice %103 {offsets = [0, 96], sizes = [8, 32], strides = [1, 1]} : vector<8x128xf32> to vector<8x32xf32>
    %111 = math.tanh %110 : vector<8x32xf32>
    %112 = vector.extract_strided_slice %109 {offsets = [0, 0], sizes = [8, 32], strides = [1, 1]} : vector<8x96xf32> to vector<8x32xf32>
    %113 = vector.extract_strided_slice %109 {offsets = [0, 32], sizes = [8, 32], strides = [1, 1]} : vector<8x96xf32> to vector<8x32xf32>
    %114 = vector.extract_strided_slice %109 {offsets = [0, 64], sizes = [8, 32], strides = [1, 1]} : vector<8x96xf32> to vector<8x32xf32>
    %115 = arith.mulf %113, %90 : vector<8x32xf32>
    %116 = arith.mulf %112, %111 : vector<8x32xf32>
    %117 = arith.addf %115, %116 : vector<8x32xf32>
    %118 = math.tanh %117 : vector<8x32xf32>
    %119 = arith.mulf %114, %118 : vector<8x32xf32>
    %120 = vector.extract_strided_slice %119 {offsets = [0, 0], sizes = [8, 16], strides = [1, 1]} : vector<8x32xf32> to vector<8x16xf32>
    %c16_48 = arith.constant 16 : index
    %c0_49 = arith.constant 0 : index
    %121 = vector.load %arg17[%c16_48, %c0_49] : memref<64x32xf32, #tpu.memory_space<vmem>>, vector<8x16xf32>
    tpu.vector_store %arg17[%c16_48, %c0_49], %120 {strides = array<i32>} : memref<64x32xf32, #tpu.memory_space<vmem>>, vector<8x16xf32>,
    %122 = vector.extract_strided_slice %119 {offsets = [0, 16], sizes = [8, 16], strides = [1, 1]} : vector<8x32xf32> to vector<8x16xf32>
    %c40 = arith.constant 40 : index
    %c16_50 = arith.constant 16 : index
    %123 = vector.load %arg17[%c40, %c16_50] : memref<64x32xf32, #tpu.memory_space<vmem>>, vector<8x16xf32>
    tpu.vector_store %arg17[%c40, %c16_50], %122 {strides = array<i32>} : memref<64x32xf32, #tpu.memory_space<vmem>>, vector<8x16xf32>,
    %124 = vector.extract_strided_slice %21 {offsets = [24, 0], sizes = [8, 128], strides = [1, 1]} : vector<64x128xf32> to vector<8x128xf32>
    %125 = vector.extract_strided_slice %21 {offsets = [32, 0], sizes = [8, 128], strides = [1, 1]} : vector<64x128xf32> to vector<8x128xf32>
    %126 = vector.shape_cast %40 : vector<1x128xi1> to vector<1x128xi1>
    %127 = vector.broadcast %126 : vector<1x128xi1> to vector<8x128xi1>
    %128 = arith.select %127, %124, %125 : vector<8x128xi1>, vector<8x128xf32>
    %cst_51 = arith.constant dense<0.000000e+00> : vector<8x128xf32>
    %129 = tpu.matmul %119, %11, %cst_51 {dimension_numbers = #tpu.dot_dimension_numbers<[1], [0], [0], [1], [0, 0, 1, 1], [], []>} : vector<8x32xf32>, vector<32x128xf32>, vector<8x128xf32> -> vector<8x128xf32>
    %130 = arith.addf %128, %129 : vector<8x128xf32>
    %131 = vector.extract_strided_slice %130 {offsets = [0, 0], sizes = [8, 96], strides = [1, 1]} : vector<8x128xf32> to vector<8x96xf32>
    %132 = arith.negf %131 : vector<8x96xf32>
    %133 = math.exp %132 : vector<8x96xf32>
    %cst_52 = arith.constant 1.000000e+00 : f32
    %134 = vector.broadcast %cst_52 : f32 to vector<8x96xf32>
    %135 = arith.addf %134, %133 : vector<8x96xf32>
    %136 = arith.divf %134, %135 : vector<8x96xf32>
    %137 = vector.extract_strided_slice %130 {offsets = [0, 96], sizes = [8, 32], strides = [1, 1]} : vector<8x128xf32> to vector<8x32xf32>
    %138 = math.tanh %137 : vector<8x32xf32>
    %139 = vector.extract_strided_slice %136 {offsets = [0, 0], sizes = [8, 32], strides = [1, 1]} : vector<8x96xf32> to vector<8x32xf32>
    %140 = vector.extract_strided_slice %136 {offsets = [0, 32], sizes = [8, 32], strides = [1, 1]} : vector<8x96xf32> to vector<8x32xf32>
    %141 = vector.extract_strided_slice %136 {offsets = [0, 64], sizes = [8, 32], strides = [1, 1]} : vector<8x96xf32> to vector<8x32xf32>
    %142 = arith.mulf %140, %117 : vector<8x32xf32>
    %143 = arith.mulf %139, %138 : vector<8x32xf32>
    %144 = arith.addf %142, %143 : vector<8x32xf32>
    %145 = math.tanh %144 : vector<8x32xf32>
    %146 = arith.mulf %141, %145 : vector<8x32xf32>
    %147 = vector.extract_strided_slice %146 {offsets = [0, 0], sizes = [8, 16], strides = [1, 1]} : vector<8x32xf32> to vector<8x16xf32>
    %c24 = arith.constant 24 : index
    %c0_53 = arith.constant 0 : index
    %148 = vector.load %arg17[%c24, %c0_53] : memref<64x32xf32, #tpu.memory_space<vmem>>, vector<8x16xf32>
    tpu.vector_store %arg17[%c24, %c0_53], %147 {strides = array<i32>} : memref<64x32xf32, #tpu.memory_space<vmem>>, vector<8x16xf32>,
    %149 = vector.extract_strided_slice %146 {offsets = [0, 16], sizes = [8, 16], strides = [1, 1]} : vector<8x32xf32> to vector<8x16xf32>
    %c32 = arith.constant 32 : index
    %c16_54 = arith.constant 16 : index
    %150 = vector.load %arg17[%c32, %c16_54] : memref<64x32xf32, #tpu.memory_space<vmem>>, vector<8x16xf32>
    tpu.vector_store %arg17[%c32, %c16_54], %149 {strides = array<i32>} : memref<64x32xf32, #tpu.memory_space<vmem>>, vector<8x16xf32>,
    %151 = vector.extract_strided_slice %21 {offsets = [32, 0], sizes = [8, 128], strides = [1, 1]} : vector<64x128xf32> to vector<8x128xf32>
    %152 = vector.extract_strided_slice %21 {offsets = [24, 0], sizes = [8, 128], strides = [1, 1]} : vector<64x128xf32> to vector<8x128xf32>
    %153 = vector.shape_cast %40 : vector<1x128xi1> to vector<1x128xi1>
    %154 = vector.broadcast %153 : vector<1x128xi1> to vector<8x128xi1>
    %155 = arith.select %154, %151, %152 : vector<8x128xi1>, vector<8x128xf32>
    %cst_55 = arith.constant dense<0.000000e+00> : vector<8x128xf32>
    %156 = tpu.matmul %146, %11, %cst_55 {dimension_numbers = #tpu.dot_dimension_numbers<[1], [0], [0], [1], [0, 0, 1, 1], [], []>} : vector<8x32xf32>, vector<32x128xf32>, vector<8x128xf32> -> vector<8x128xf32>
    %157 = arith.addf %155, %156 : vector<8x128xf32>
    %158 = vector.extract_strided_slice %157 {offsets = [0, 0], sizes = [8, 96], strides = [1, 1]} : vector<8x128xf32> to vector<8x96xf32>
    %159 = arith.negf %158 : vector<8x96xf32>
    %160 = math.exp %159 : vector<8x96xf32>
    %cst_56 = arith.constant 1.000000e+00 : f32
    %161 = vector.broadcast %cst_56 : f32 to vector<8x96xf32>
    %162 = arith.addf %161, %160 : vector<8x96xf32>
    %163 = arith.divf %161, %162 : vector<8x96xf32>
    %164 = vector.extract_strided_slice %157 {offsets = [0, 96], sizes = [8, 32], strides = [1, 1]} : vector<8x128xf32> to vector<8x32xf32>
    %165 = math.tanh %164 : vector<8x32xf32>
    %166 = vector.extract_strided_slice %163 {offsets = [0, 0], sizes = [8, 32], strides = [1, 1]} : vector<8x96xf32> to vector<8x32xf32>
    %167 = vector.extract_strided_slice %163 {offsets = [0, 32], sizes = [8, 32], strides = [1, 1]} : vector<8x96xf32> to vector<8x32xf32>
    %168 = vector.extract_strided_slice %163 {offsets = [0, 64], sizes = [8, 32], strides = [1, 1]} : vector<8x96xf32> to vector<8x32xf32>
    %169 = arith.mulf %167, %144 : vector<8x32xf32>
    %170 = arith.mulf %166, %165 : vector<8x32xf32>
    %171 = arith.addf %169, %170 : vector<8x32xf32>
    %172 = math.tanh %171 : vector<8x32xf32>
    %173 = arith.mulf %168, %172 : vector<8x32xf32>
    %174 = vector.extract_strided_slice %173 {offsets = [0, 0], sizes = [8, 16], strides = [1, 1]} : vector<8x32xf32> to vector<8x16xf32>
    %c32_57 = arith.constant 32 : index
    %c0_58 = arith.constant 0 : index
    %175 = vector.load %arg17[%c32_57, %c0_58] : memref<64x32xf32, #tpu.memory_space<vmem>>, vector<8x16xf32>
    tpu.vector_store %arg17[%c32_57, %c0_58], %174 {strides = array<i32>} : memref<64x32xf32, #tpu.memory_space<vmem>>, vector<8x16xf32>,
    %176 = vector.extract_strided_slice %173 {offsets = [0, 16], sizes = [8, 16], strides = [1, 1]} : vector<8x32xf32> to vector<8x16xf32>
    %c24_59 = arith.constant 24 : index
    %c16_60 = arith.constant 16 : index
    %177 = vector.load %arg17[%c24_59, %c16_60] : memref<64x32xf32, #tpu.memory_space<vmem>>, vector<8x16xf32>
    tpu.vector_store %arg17[%c24_59, %c16_60], %176 {strides = array<i32>} : memref<64x32xf32, #tpu.memory_space<vmem>>, vector<8x16xf32>,
    %178 = vector.extract_strided_slice %21 {offsets = [40, 0], sizes = [8, 128], strides = [1, 1]} : vector<64x128xf32> to vector<8x128xf32>
    %179 = vector.extract_strided_slice %21 {offsets = [16, 0], sizes = [8, 128], strides = [1, 1]} : vector<64x128xf32> to vector<8x128xf32>
    %180 = vector.shape_cast %40 : vector<1x128xi1> to vector<1x128xi1>
    %181 = vector.broadcast %180 : vector<1x128xi1> to vector<8x128xi1>
    %182 = arith.select %181, %178, %179 : vector<8x128xi1>, vector<8x128xf32>
    %cst_61 = arith.constant dense<0.000000e+00> : vector<8x128xf32>
    %183 = tpu.matmul %173, %11, %cst_61 {dimension_numbers = #tpu.dot_dimension_numbers<[1], [0], [0], [1], [0, 0, 1, 1], [], []>} : vector<8x32xf32>, vector<32x128xf32>, vector<8x128xf32> -> vector<8x128xf32>
    %184 = arith.addf %182, %183 : vector<8x128xf32>
    %185 = vector.extract_strided_slice %184 {offsets = [0, 0], sizes = [8, 96], strides = [1, 1]} : vector<8x128xf32> to vector<8x96xf32>
    %186 = arith.negf %185 : vector<8x96xf32>
    %187 = math.exp %186 : vector<8x96xf32>
    %cst_62 = arith.constant 1.000000e+00 : f32
    %188 = vector.broadcast %cst_62 : f32 to vector<8x96xf32>
    %189 = arith.addf %188, %187 : vector<8x96xf32>
    %190 = arith.divf %188, %189 : vector<8x96xf32>
    %191 = vector.extract_strided_slice %184 {offsets = [0, 96], sizes = [8, 32], strides = [1, 1]} : vector<8x128xf32> to vector<8x32xf32>
    %192 = math.tanh %191 : vector<8x32xf32>
    %193 = vector.extract_strided_slice %190 {offsets = [0, 0], sizes = [8, 32], strides = [1, 1]} : vector<8x96xf32> to vector<8x32xf32>
    %194 = vector.extract_strided_slice %190 {offsets = [0, 32], sizes = [8, 32], strides = [1, 1]} : vector<8x96xf32> to vector<8x32xf32>
    %195 = vector.extract_strided_slice %190 {offsets = [0, 64], sizes = [8, 32], strides = [1, 1]} : vector<8x96xf32> to vector<8x32xf32>
    %196 = arith.mulf %194, %171 : vector<8x32xf32>
    %197 = arith.mulf %193, %192 : vector<8x32xf32>
    %198 = arith.addf %196, %197 : vector<8x32xf32>
    %199 = math.tanh %198 : vector<8x32xf32>
    %200 = arith.mulf %195, %199 : vector<8x32xf32>
    %201 = vector.extract_strided_slice %200 {offsets = [0, 0], sizes = [8, 16], strides = [1, 1]} : vector<8x32xf32> to vector<8x16xf32>
    %c40_63 = arith.constant 40 : index
    %c0_64 = arith.constant 0 : index
    %202 = vector.load %arg17[%c40_63, %c0_64] : memref<64x32xf32, #tpu.memory_space<vmem>>, vector<8x16xf32>
    tpu.vector_store %arg17[%c40_63, %c0_64], %201 {strides = array<i32>} : memref<64x32xf32, #tpu.memory_space<vmem>>, vector<8x16xf32>,
    %203 = vector.extract_strided_slice %200 {offsets = [0, 16], sizes = [8, 16], strides = [1, 1]} : vector<8x32xf32> to vector<8x16xf32>
    %c16_65 = arith.constant 16 : index
    %c16_66 = arith.constant 16 : index
    %204 = vector.load %arg17[%c16_65, %c16_66] : memref<64x32xf32, #tpu.memory_space<vmem>>, vector<8x16xf32>
    tpu.vector_store %arg17[%c16_65, %c16_66], %203 {strides = array<i32>} : memref<64x32xf32, #tpu.memory_space<vmem>>, vector<8x16xf32>,
    %205 = vector.extract_strided_slice %21 {offsets = [48, 0], sizes = [8, 128], strides = [1, 1]} : vector<64x128xf32> to vector<8x128xf32>
    %206 = vector.extract_strided_slice %21 {offsets = [8, 0], sizes = [8, 128], strides = [1, 1]} : vector<64x128xf32> to vector<8x128xf32>
    %207 = vector.shape_cast %40 : vector<1x128xi1> to vector<1x128xi1>
    %208 = vector.broadcast %207 : vector<1x128xi1> to vector<8x128xi1>
    %209 = arith.select %208, %205, %206 : vector<8x128xi1>, vector<8x128xf32>
    %cst_67 = arith.constant dense<0.000000e+00> : vector<8x128xf32>
    %210 = tpu.matmul %200, %11, %cst_67 {dimension_numbers = #tpu.dot_dimension_numbers<[1], [0], [0], [1], [0, 0, 1, 1], [], []>} : vector<8x32xf32>, vector<32x128xf32>, vector<8x128xf32> -> vector<8x128xf32>
    %211 = arith.addf %209, %210 : vector<8x128xf32>
    %212 = vector.extract_strided_slice %211 {offsets = [0, 0], sizes = [8, 96], strides = [1, 1]} : vector<8x128xf32> to vector<8x96xf32>
    %213 = arith.negf %212 : vector<8x96xf32>
    %214 = math.exp %213 : vector<8x96xf32>
    %cst_68 = arith.constant 1.000000e+00 : f32
    %215 = vector.broadcast %cst_68 : f32 to vector<8x96xf32>
    %216 = arith.addf %215, %214 : vector<8x96xf32>
    %217 = arith.divf %215, %216 : vector<8x96xf32>
    %218 = vector.extract_strided_slice %211 {offsets = [0, 96], sizes = [8, 32], strides = [1, 1]} : vector<8x128xf32> to vector<8x32xf32>
    %219 = math.tanh %218 : vector<8x32xf32>
    %220 = vector.extract_strided_slice %217 {offsets = [0, 0], sizes = [8, 32], strides = [1, 1]} : vector<8x96xf32> to vector<8x32xf32>
    %221 = vector.extract_strided_slice %217 {offsets = [0, 32], sizes = [8, 32], strides = [1, 1]} : vector<8x96xf32> to vector<8x32xf32>
    %222 = vector.extract_strided_slice %217 {offsets = [0, 64], sizes = [8, 32], strides = [1, 1]} : vector<8x96xf32> to vector<8x32xf32>
    %223 = arith.mulf %221, %198 : vector<8x32xf32>
    %224 = arith.mulf %220, %219 : vector<8x32xf32>
    %225 = arith.addf %223, %224 : vector<8x32xf32>
    %226 = math.tanh %225 : vector<8x32xf32>
    %227 = arith.mulf %222, %226 : vector<8x32xf32>
    %228 = vector.extract_strided_slice %227 {offsets = [0, 0], sizes = [8, 16], strides = [1, 1]} : vector<8x32xf32> to vector<8x16xf32>
    %c48_69 = arith.constant 48 : index
    %c0_70 = arith.constant 0 : index
    %229 = vector.load %arg17[%c48_69, %c0_70] : memref<64x32xf32, #tpu.memory_space<vmem>>, vector<8x16xf32>
    tpu.vector_store %arg17[%c48_69, %c0_70], %228 {strides = array<i32>} : memref<64x32xf32, #tpu.memory_space<vmem>>, vector<8x16xf32>,
    %230 = vector.extract_strided_slice %227 {offsets = [0, 16], sizes = [8, 16], strides = [1, 1]} : vector<8x32xf32> to vector<8x16xf32>
    %c8_71 = arith.constant 8 : index
    %c16_72 = arith.constant 16 : index
    %231 = vector.load %arg17[%c8_71, %c16_72] : memref<64x32xf32, #tpu.memory_space<vmem>>, vector<8x16xf32>
    tpu.vector_store %arg17[%c8_71, %c16_72], %230 {strides = array<i32>} : memref<64x32xf32, #tpu.memory_space<vmem>>, vector<8x16xf32>,
    %232 = vector.extract_strided_slice %21 {offsets = [56, 0], sizes = [8, 128], strides = [1, 1]} : vector<64x128xf32> to vector<8x128xf32>
    %233 = vector.extract_strided_slice %21 {offsets = [0, 0], sizes = [8, 128], strides = [1, 1]} : vector<64x128xf32> to vector<8x128xf32>
    %234 = vector.shape_cast %40 : vector<1x128xi1> to vector<1x128xi1>
    %235 = vector.broadcast %234 : vector<1x128xi1> to vector<8x128xi1>
    %236 = arith.select %235, %232, %233 : vector<8x128xi1>, vector<8x128xf32>
    %cst_73 = arith.constant dense<0.000000e+00> : vector<8x128xf32>
    %237 = tpu.matmul %227, %11, %cst_73 {dimension_numbers = #tpu.dot_dimension_numbers<[1], [0], [0], [1], [0, 0, 1, 1], [], []>} : vector<8x32xf32>, vector<32x128xf32>, vector<8x128xf32> -> vector<8x128xf32>
    %238 = arith.addf %236, %237 : vector<8x128xf32>
    %239 = vector.extract_strided_slice %238 {offsets = [0, 0], sizes = [8, 96], strides = [1, 1]} : vector<8x128xf32> to vector<8x96xf32>
    %240 = arith.negf %239 : vector<8x96xf32>
    %241 = math.exp %240 : vector<8x96xf32>
    %cst_74 = arith.constant 1.000000e+00 : f32
    %242 = vector.broadcast %cst_74 : f32 to vector<8x96xf32>
    %243 = arith.addf %242, %241 : vector<8x96xf32>
    %244 = arith.divf %242, %243 : vector<8x96xf32>
    %245 = vector.extract_strided_slice %238 {offsets = [0, 96], sizes = [8, 32], strides = [1, 1]} : vector<8x128xf32> to vector<8x32xf32>
    %246 = math.tanh %245 : vector<8x32xf32>
    %247 = vector.extract_strided_slice %244 {offsets = [0, 0], sizes = [8, 32], strides = [1, 1]} : vector<8x96xf32> to vector<8x32xf32>
    %248 = vector.extract_strided_slice %244 {offsets = [0, 32], sizes = [8, 32], strides = [1, 1]} : vector<8x96xf32> to vector<8x32xf32>
    %249 = vector.extract_strided_slice %244 {offsets = [0, 64], sizes = [8, 32], strides = [1, 1]} : vector<8x96xf32> to vector<8x32xf32>
    %250 = arith.mulf %248, %225 : vector<8x32xf32>
    %251 = arith.mulf %247, %246 : vector<8x32xf32>
    %252 = arith.addf %250, %251 : vector<8x32xf32>
    %253 = math.tanh %252 : vector<8x32xf32>
    %254 = arith.mulf %249, %253 : vector<8x32xf32>
    %255 = vector.extract_strided_slice %254 {offsets = [0, 0], sizes = [8, 16], strides = [1, 1]} : vector<8x32xf32> to vector<8x16xf32>
    %c56_75 = arith.constant 56 : index
    %c0_76 = arith.constant 0 : index
    %256 = vector.load %arg17[%c56_75, %c0_76] : memref<64x32xf32, #tpu.memory_space<vmem>>, vector<8x16xf32>
    tpu.vector_store %arg17[%c56_75, %c0_76], %255 {strides = array<i32>} : memref<64x32xf32, #tpu.memory_space<vmem>>, vector<8x16xf32>,
    %257 = vector.extract_strided_slice %254 {offsets = [0, 16], sizes = [8, 16], strides = [1, 1]} : vector<8x32xf32> to vector<8x16xf32>
    %c0_77 = arith.constant 0 : index
    %c16_78 = arith.constant 16 : index
    %258 = vector.load %arg17[%c0_77, %c16_78] : memref<64x32xf32, #tpu.memory_space<vmem>>, vector<8x16xf32>
    tpu.vector_store %arg17[%c0_77, %c16_78], %257 {strides = array<i32>} : memref<64x32xf32, #tpu.memory_space<vmem>>, vector<8x16xf32>,
    %c0_79 = arith.constant 0 : index
    %c0_80 = arith.constant 0 : index
    %259 = vector.load %arg17[%c0_79, %c0_80] : memref<64x32xf32, #tpu.memory_space<vmem>>, vector<64x32xf32>
    %cst_81 = arith.constant dense<0.000000e+00> : vector<64x6xf32>
    %260 = tpu.matmul %259, %12, %cst_81 {dimension_numbers = #tpu.dot_dimension_numbers<[1], [0], [0], [1], [0, 0, 1, 1], [], []>} : vector<64x32xf32>, vector<32x6xf32>, vector<64x6xf32> -> vector<64x6xf32>
    %261 = vector.broadcast %13 : vector<1x6xf32> to vector<64x6xf32>
    %262 = arith.addf %260, %261 : vector<64x6xf32>
    %263 = vector.broadcast %7 : vector<64x1xf32> to vector<64x6xf32>
    %264 = arith.mulf %263, %262 : vector<64x6xf32>
    %265 = arith.mulf %264, %3 : vector<64x6xf32>
    %cst_82 = arith.constant dense<0.000000e+00> : vector<8x6xf32>
    %266 = tpu.matmul %8, %265, %cst_82 {dimension_numbers = #tpu.dot_dimension_numbers<[1], [0], [0], [1], [0, 0, 1, 1], [], []>} : vector<8x64xf32>, vector<64x6xf32>, vector<8x6xf32> -> vector<8x6xf32>
    %267 = vector.extract_strided_slice %3 {offsets = [0, 0], sizes = [8, 6], strides = [1, 1]} : vector<64x6xf32> to vector<8x6xf32>
    %268 = vector.broadcast %14 : vector<1x6xf32> to vector<8x6xf32>
    %269 = arith.mulf %268, %267 : vector<8x6xf32>
    %270 = arith.addf %266, %269 : vector<8x6xf32>
    %271 = vector.broadcast %15 : vector<1x6xf32> to vector<8x6xf32>
    %272 = arith.mulf %271, %5 : vector<8x6xf32>
    %273 = arith.addf %270, %272 : vector<8x6xf32>
    %274 = vector.extract_strided_slice %3 {offsets = [0, 0], sizes = [56, 6], strides = [1, 1]} : vector<64x6xf32> to vector<56x6xf32>
    %cst_83 = arith.constant dense<0.000000e+00> : vector<56x6xf32>
    %275 = tpu.matmul %274, %16, %cst_83 {dimension_numbers = #tpu.dot_dimension_numbers<[1], [0], [0], [1], [0, 0, 1, 1], [], []>} : vector<56x6xf32>, vector<6x6xf32>, vector<56x6xf32> -> vector<56x6xf32>
    %276 = vector.extract_strided_slice %3 {offsets = [8, 0], sizes = [56, 6], strides = [1, 1]} : vector<64x6xf32> to vector<56x6xf32>
    %277 = arith.mulf %275, %276 : vector<56x6xf32>
    %278 = vector.extract_strided_slice %7 {offsets = [8, 0], sizes = [56, 1], strides = [1, 1]} : vector<64x1xf32> to vector<56x1xf32>
    %279 = vector.broadcast %278 : vector<56x1xf32> to vector<56x6xf32>
    %280 = arith.mulf %277, %279 : vector<56x6xf32>
    %281 = vector.extract_strided_slice %8 {offsets = [0, 0], sizes = [8, 56], strides = [1, 1]} : vector<8x64xf32> to vector<8x56xf32>
    %cst_84 = arith.constant dense<0.000000e+00> : vector<8x6xf32>
    %282 = tpu.matmul %281, %280, %cst_84 {dimension_numbers = #tpu.dot_dimension_numbers<[1], [0], [0], [1], [0, 0, 1, 1], [], []>} : vector<8x56xf32>, vector<56x6xf32>, vector<8x6xf32> -> vector<8x6xf32>
    %283 = arith.addf %273, %282 : vector<8x6xf32>
    %cst_85 = arith.constant dense<0.000000e+00> : vector<8xf32>
    %284 = vector.multi_reduction <add>, %283, %cst_85 [1] : vector<8x6xf32> to vector<8xf32>
    %285 = vector.shape_cast %284 : vector<8xf32> to vector<8x1xf32>
    %286 = vector.extract_strided_slice %262 {offsets = [0, 0], sizes = [8, 6], strides = [1, 1]} : vector<64x6xf32> to vector<8x6xf32>
    %287 = vector.broadcast %14 : vector<1x6xf32> to vector<8x6xf32>
    %288 = arith.addf %287, %286 : vector<8x6xf32>
    %cst_86 = arith.constant dense<0xFF800000> : vector<8xf32>
    %289 = vector.multi_reduction <maximumf>, %288, %cst_86 [1] : vector<8x6xf32> to vector<8xf32>
    %290 = vector.shape_cast %289 : vector<8xf32> to vector<8x1xf32>
    %291 = vector.broadcast %290 : vector<8x1xf32> to vector<8x6xf32>
    %292 = arith.subf %288, %291 : vector<8x6xf32>
    %293 = math.exp %292 : vector<8x6xf32>
    %cst_87 = arith.constant dense<0.000000e+00> : vector<8x6xf32>
    %294 = tpu.matmul %293, %17, %cst_87 {dimension_numbers = #tpu.dot_dimension_numbers<[1], [0], [0], [1], [0, 0, 1, 1], [], []>} : vector<8x6xf32>, vector<6x6xf32>, vector<8x6xf32> -> vector<8x6xf32>
    %295 = vector.extract_strided_slice %262 {offsets = [8, 0], sizes = [8, 6], strides = [1, 1]} : vector<64x6xf32> to vector<8x6xf32>
    %296 = vector.broadcast %290 : vector<8x1xf32> to vector<8x6xf32>
    %297 = arith.addf %295, %296 : vector<8x6xf32>
    %298 = vector.broadcast %18 : vector<1x6xf32> to vector<8x6xf32>
    %299 = arith.addf %297, %298 : vector<8x6xf32>
    %300 = math.log %294 : vector<8x6xf32>
    %301 = arith.addf %299, %300 : vector<8x6xf32>
    %302 = vector.extract_strided_slice %7 {offsets = [8, 0], sizes = [8, 1], strides = [1, 1]} : vector<64x1xf32> to vector<8x1xf32>
    %cst_88 = arith.constant 5.000000e-01 : f32
    %303 = vector.broadcast %cst_88 : f32 to vector<8x1xf32>
    %304 = arith.cmpf ogt, %302, %303 : vector<8x1xf32>
    %305 = vector.shape_cast %304 : vector<8x1xi1> to vector<8x1xi1>
    %306 = vector.broadcast %305 : vector<8x1xi1> to vector<8x6xi1>
    %307 = arith.select %306, %301, %288 : vector<8x6xi1>, vector<8x6xf32>
    %cst_89 = arith.constant dense<0xFF800000> : vector<8xf32>
    %308 = vector.multi_reduction <maximumf>, %307, %cst_89 [1] : vector<8x6xf32> to vector<8xf32>
    %309 = vector.shape_cast %308 : vector<8xf32> to vector<8x1xf32>
    %310 = vector.broadcast %309 : vector<8x1xf32> to vector<8x6xf32>
    %311 = arith.subf %307, %310 : vector<8x6xf32>
    %312 = math.exp %311 : vector<8x6xf32>
    %cst_90 = arith.constant dense<0.000000e+00> : vector<8x6xf32>
    %313 = tpu.matmul %312, %17, %cst_90 {dimension_numbers = #tpu.dot_dimension_numbers<[1], [0], [0], [1], [0, 0, 1, 1], [], []>} : vector<8x6xf32>, vector<6x6xf32>, vector<8x6xf32> -> vector<8x6xf32>
    %314 = vector.extract_strided_slice %262 {offsets = [16, 0], sizes = [8, 6], strides = [1, 1]} : vector<64x6xf32> to vector<8x6xf32>
    %315 = vector.broadcast %309 : vector<8x1xf32> to vector<8x6xf32>
    %316 = arith.addf %314, %315 : vector<8x6xf32>
    %317 = vector.broadcast %18 : vector<1x6xf32> to vector<8x6xf32>
    %318 = arith.addf %316, %317 : vector<8x6xf32>
    %319 = math.log %313 : vector<8x6xf32>
    %320 = arith.addf %318, %319 : vector<8x6xf32>
    %321 = vector.extract_strided_slice %7 {offsets = [16, 0], sizes = [8, 1], strides = [1, 1]} : vector<64x1xf32> to vector<8x1xf32>
    %cst_91 = arith.constant 5.000000e-01 : f32
    %322 = vector.broadcast %cst_91 : f32 to vector<8x1xf32>
    %323 = arith.cmpf ogt, %321, %322 : vector<8x1xf32>
    %324 = vector.shape_cast %323 : vector<8x1xi1> to vector<8x1xi1>
    %325 = vector.broadcast %324 : vector<8x1xi1> to vector<8x6xi1>
    %326 = arith.select %325, %320, %307 : vector<8x6xi1>, vector<8x6xf32>
    %cst_92 = arith.constant dense<0xFF800000> : vector<8xf32>
    %327 = vector.multi_reduction <maximumf>, %326, %cst_92 [1] : vector<8x6xf32> to vector<8xf32>
    %328 = vector.shape_cast %327 : vector<8xf32> to vector<8x1xf32>
    %329 = vector.broadcast %328 : vector<8x1xf32> to vector<8x6xf32>
    %330 = arith.subf %326, %329 : vector<8x6xf32>
    %331 = math.exp %330 : vector<8x6xf32>
    %cst_93 = arith.constant dense<0.000000e+00> : vector<8x6xf32>
    %332 = tpu.matmul %331, %17, %cst_93 {dimension_numbers = #tpu.dot_dimension_numbers<[1], [0], [0], [1], [0, 0, 1, 1], [], []>} : vector<8x6xf32>, vector<6x6xf32>, vector<8x6xf32> -> vector<8x6xf32>
    %333 = vector.extract_strided_slice %262 {offsets = [24, 0], sizes = [8, 6], strides = [1, 1]} : vector<64x6xf32> to vector<8x6xf32>
    %334 = vector.broadcast %328 : vector<8x1xf32> to vector<8x6xf32>
    %335 = arith.addf %333, %334 : vector<8x6xf32>
    %336 = vector.broadcast %18 : vector<1x6xf32> to vector<8x6xf32>
    %337 = arith.addf %335, %336 : vector<8x6xf32>
    %338 = math.log %332 : vector<8x6xf32>
    %339 = arith.addf %337, %338 : vector<8x6xf32>
    %340 = vector.extract_strided_slice %7 {offsets = [24, 0], sizes = [8, 1], strides = [1, 1]} : vector<64x1xf32> to vector<8x1xf32>
    %cst_94 = arith.constant 5.000000e-01 : f32
    %341 = vector.broadcast %cst_94 : f32 to vector<8x1xf32>
    %342 = arith.cmpf ogt, %340, %341 : vector<8x1xf32>
    %343 = vector.shape_cast %342 : vector<8x1xi1> to vector<8x1xi1>
    %344 = vector.broadcast %343 : vector<8x1xi1> to vector<8x6xi1>
    %345 = arith.select %344, %339, %326 : vector<8x6xi1>, vector<8x6xf32>
    %cst_95 = arith.constant dense<0xFF800000> : vector<8xf32>
    %346 = vector.multi_reduction <maximumf>, %345, %cst_95 [1] : vector<8x6xf32> to vector<8xf32>
    %347 = vector.shape_cast %346 : vector<8xf32> to vector<8x1xf32>
    %348 = vector.broadcast %347 : vector<8x1xf32> to vector<8x6xf32>
    %349 = arith.subf %345, %348 : vector<8x6xf32>
    %350 = math.exp %349 : vector<8x6xf32>
    %cst_96 = arith.constant dense<0.000000e+00> : vector<8x6xf32>
    %351 = tpu.matmul %350, %17, %cst_96 {dimension_numbers = #tpu.dot_dimension_numbers<[1], [0], [0], [1], [0, 0, 1, 1], [], []>} : vector<8x6xf32>, vector<6x6xf32>, vector<8x6xf32> -> vector<8x6xf32>
    %352 = vector.extract_strided_slice %262 {offsets = [32, 0], sizes = [8, 6], strides = [1, 1]} : vector<64x6xf32> to vector<8x6xf32>
    %353 = vector.broadcast %347 : vector<8x1xf32> to vector<8x6xf32>
    %354 = arith.addf %352, %353 : vector<8x6xf32>
    %355 = vector.broadcast %18 : vector<1x6xf32> to vector<8x6xf32>
    %356 = arith.addf %354, %355 : vector<8x6xf32>
    %357 = math.log %351 : vector<8x6xf32>
    %358 = arith.addf %356, %357 : vector<8x6xf32>
    %359 = vector.extract_strided_slice %7 {offsets = [32, 0], sizes = [8, 1], strides = [1, 1]} : vector<64x1xf32> to vector<8x1xf32>
    %cst_97 = arith.constant 5.000000e-01 : f32
    %360 = vector.broadcast %cst_97 : f32 to vector<8x1xf32>
    %361 = arith.cmpf ogt, %359, %360 : vector<8x1xf32>
    %362 = vector.shape_cast %361 : vector<8x1xi1> to vector<8x1xi1>
    %363 = vector.broadcast %362 : vector<8x1xi1> to vector<8x6xi1>
    %364 = arith.select %363, %358, %345 : vector<8x6xi1>, vector<8x6xf32>
    %cst_98 = arith.constant dense<0xFF800000> : vector<8xf32>
    %365 = vector.multi_reduction <maximumf>, %364, %cst_98 [1] : vector<8x6xf32> to vector<8xf32>
    %366 = vector.shape_cast %365 : vector<8xf32> to vector<8x1xf32>
    %367 = vector.broadcast %366 : vector<8x1xf32> to vector<8x6xf32>
    %368 = arith.subf %364, %367 : vector<8x6xf32>
    %369 = math.exp %368 : vector<8x6xf32>
    %cst_99 = arith.constant dense<0.000000e+00> : vector<8x6xf32>
    %370 = tpu.matmul %369, %17, %cst_99 {dimension_numbers = #tpu.dot_dimension_numbers<[1], [0], [0], [1], [0, 0, 1, 1], [], []>} : vector<8x6xf32>, vector<6x6xf32>, vector<8x6xf32> -> vector<8x6xf32>
    %371 = vector.extract_strided_slice %262 {offsets = [40, 0], sizes = [8, 6], strides = [1, 1]} : vector<64x6xf32> to vector<8x6xf32>
    %372 = vector.broadcast %366 : vector<8x1xf32> to vector<8x6xf32>
    %373 = arith.addf %371, %372 : vector<8x6xf32>
    %374 = vector.broadcast %18 : vector<1x6xf32> to vector<8x6xf32>
    %375 = arith.addf %373, %374 : vector<8x6xf32>
    %376 = math.log %370 : vector<8x6xf32>
    %377 = arith.addf %375, %376 : vector<8x6xf32>
    %378 = vector.extract_strided_slice %7 {offsets = [40, 0], sizes = [8, 1], strides = [1, 1]} : vector<64x1xf32> to vector<8x1xf32>
    %cst_100 = arith.constant 5.000000e-01 : f32
    %379 = vector.broadcast %cst_100 : f32 to vector<8x1xf32>
    %380 = arith.cmpf ogt, %378, %379 : vector<8x1xf32>
    %381 = vector.shape_cast %380 : vector<8x1xi1> to vector<8x1xi1>
    %382 = vector.broadcast %381 : vector<8x1xi1> to vector<8x6xi1>
    %383 = arith.select %382, %377, %364 : vector<8x6xi1>, vector<8x6xf32>
    %cst_101 = arith.constant dense<0xFF800000> : vector<8xf32>
    %384 = vector.multi_reduction <maximumf>, %383, %cst_101 [1] : vector<8x6xf32> to vector<8xf32>
    %385 = vector.shape_cast %384 : vector<8xf32> to vector<8x1xf32>
    %386 = vector.broadcast %385 : vector<8x1xf32> to vector<8x6xf32>
    %387 = arith.subf %383, %386 : vector<8x6xf32>
    %388 = math.exp %387 : vector<8x6xf32>
    %cst_102 = arith.constant dense<0.000000e+00> : vector<8x6xf32>
    %389 = tpu.matmul %388, %17, %cst_102 {dimension_numbers = #tpu.dot_dimension_numbers<[1], [0], [0], [1], [0, 0, 1, 1], [], []>} : vector<8x6xf32>, vector<6x6xf32>, vector<8x6xf32> -> vector<8x6xf32>
    %390 = vector.extract_strided_slice %262 {offsets = [48, 0], sizes = [8, 6], strides = [1, 1]} : vector<64x6xf32> to vector<8x6xf32>
    %391 = vector.broadcast %385 : vector<8x1xf32> to vector<8x6xf32>
    %392 = arith.addf %390, %391 : vector<8x6xf32>
    %393 = vector.broadcast %18 : vector<1x6xf32> to vector<8x6xf32>
    %394 = arith.addf %392, %393 : vector<8x6xf32>
    %395 = math.log %389 : vector<8x6xf32>
    %396 = arith.addf %394, %395 : vector<8x6xf32>
    %397 = vector.extract_strided_slice %7 {offsets = [48, 0], sizes = [8, 1], strides = [1, 1]} : vector<64x1xf32> to vector<8x1xf32>
    %cst_103 = arith.constant 5.000000e-01 : f32
    %398 = vector.broadcast %cst_103 : f32 to vector<8x1xf32>
    %399 = arith.cmpf ogt, %397, %398 : vector<8x1xf32>
    %400 = vector.shape_cast %399 : vector<8x1xi1> to vector<8x1xi1>
    %401 = vector.broadcast %400 : vector<8x1xi1> to vector<8x6xi1>
    %402 = arith.select %401, %396, %383 : vector<8x6xi1>, vector<8x6xf32>
    %cst_104 = arith.constant dense<0xFF800000> : vector<8xf32>
    %403 = vector.multi_reduction <maximumf>, %402, %cst_104 [1] : vector<8x6xf32> to vector<8xf32>
    %404 = vector.shape_cast %403 : vector<8xf32> to vector<8x1xf32>
    %405 = vector.broadcast %404 : vector<8x1xf32> to vector<8x6xf32>
    %406 = arith.subf %402, %405 : vector<8x6xf32>
    %407 = math.exp %406 : vector<8x6xf32>
    %cst_105 = arith.constant dense<0.000000e+00> : vector<8x6xf32>
    %408 = tpu.matmul %407, %17, %cst_105 {dimension_numbers = #tpu.dot_dimension_numbers<[1], [0], [0], [1], [0, 0, 1, 1], [], []>} : vector<8x6xf32>, vector<6x6xf32>, vector<8x6xf32> -> vector<8x6xf32>
    %409 = vector.extract_strided_slice %262 {offsets = [56, 0], sizes = [8, 6], strides = [1, 1]} : vector<64x6xf32> to vector<8x6xf32>
    %410 = vector.broadcast %404 : vector<8x1xf32> to vector<8x6xf32>
    %411 = arith.addf %409, %410 : vector<8x6xf32>
    %412 = vector.broadcast %18 : vector<1x6xf32> to vector<8x6xf32>
    %413 = arith.addf %411, %412 : vector<8x6xf32>
    %414 = math.log %408 : vector<8x6xf32>
    %415 = arith.addf %413, %414 : vector<8x6xf32>
    %416 = vector.extract_strided_slice %7 {offsets = [56, 0], sizes = [8, 1], strides = [1, 1]} : vector<64x1xf32> to vector<8x1xf32>
    %cst_106 = arith.constant 5.000000e-01 : f32
    %417 = vector.broadcast %cst_106 : f32 to vector<8x1xf32>
    %418 = arith.cmpf ogt, %416, %417 : vector<8x1xf32>
    %419 = vector.shape_cast %418 : vector<8x1xi1> to vector<8x1xi1>
    %420 = vector.broadcast %419 : vector<8x1xi1> to vector<8x6xi1>
    %421 = arith.select %420, %415, %402 : vector<8x6xi1>, vector<8x6xf32>
    %422 = vector.broadcast %15 : vector<1x6xf32> to vector<8x6xf32>
    %423 = arith.addf %421, %422 : vector<8x6xf32>
    %cst_107 = arith.constant dense<0xFF800000> : vector<8xf32>
    %424 = vector.multi_reduction <maximumf>, %423, %cst_107 [1] : vector<8x6xf32> to vector<8xf32>
    %425 = vector.shape_cast %424 : vector<8xf32> to vector<8x1xf32>
    %426 = vector.broadcast %425 : vector<8x1xf32> to vector<8x6xf32>
    %427 = arith.subf %423, %426 : vector<8x6xf32>
    %428 = math.exp %427 : vector<8x6xf32>
    %cst_108 = arith.constant dense<0.000000e+00> : vector<8xf32>
    %429 = vector.multi_reduction <add>, %428, %cst_108 [1] : vector<8x6xf32> to vector<8xf32>
    %430 = vector.shape_cast %429 : vector<8xf32> to vector<8x1xf32>
    %431 = math.log %430 : vector<8x1xf32>
    %432 = arith.addf %425, %431 : vector<8x1xf32>
    %433 = arith.subf %432, %285 : vector<8x1xf32>
    %434 = tpu.iota {dimensions = array<i32: 0>} : vector<8x8xi32>
    %435 = tpu.iota {dimensions = array<i32: 1>} : vector<8x8xi32>
    %436 = arith.cmpi eq, %434, %435 : vector<8x8xi32>
    %cst_109 = arith.constant 0.000000e+00 : f32
    %437 = vector.shape_cast %433 : vector<8x1xf32> to vector<8x1xf32>
    %438 = vector.broadcast %437 : vector<8x1xf32> to vector<8x8xf32>
    %439 = vector.broadcast %cst_109 : f32 to vector<8x8xf32>
    %440 = arith.select %436, %438, %439 : vector<8x8xi1>, vector<8x8xf32>
    %cst_110 = arith.constant dense<0.000000e+00> : vector<8xf32>
    %441 = vector.multi_reduction <add>, %440, %cst_110 [0] : vector<8x8xf32> to vector<8xf32>
    %442 = vector.shape_cast %441 : vector<8xf32> to vector<1x8xf32>
    %c0_111 = arith.constant 0 : index
    %c0_112 = arith.constant 0 : index
    %c0_113 = arith.constant 0 : index
    %443 = vector.load %arg16[%c0_111, %c0_112, %c0_113] : memref<1x1x8xf32, #tpu.memory_space<vmem>>, vector<1x1x8xf32>
    %444 = vector.shape_cast %443 : vector<1x1x8xf32> to vector<1x8xf32>
    %445 = vector.shape_cast %442 : vector<1x8xf32> to vector<1x1x8xf32>
    tpu.vector_store %arg16[%c0_111, %c0_112, %c0_113], %445 {strides = array<i32>} : memref<1x1x8xf32, #tpu.memory_space<vmem>>, vector<1x1x8xf32>,
    return
  }
  func.func @transform_0(%arg0: i32) -> (i32, i32, i32) {
    %c0_i32 = arith.constant 0 : i32
    %c0_i32_0 = arith.constant 0 : i32
    %c0_i32_1 = arith.constant 0 : i32
    return %arg0, %c0_i32, %c0_i32_0 : i32, i32, i32
  }
  func.func @transform_1(%arg0: i32) -> (i32, i32) {
    %c0_i32 = arith.constant 0 : i32
    %c0_i32_0 = arith.constant 0 : i32
    %c0_i32_1 = arith.constant 0 : i32
    return %c0_i32, %c0_i32_0 : i32, i32
  }
  func.func @transform_2(%arg0: i32) -> (i32, i32) {
    %c0_i32 = arith.constant 0 : i32
    %c0_i32_0 = arith.constant 0 : i32
    %c0_i32_1 = arith.constant 0 : i32
    return %c0_i32, %c0_i32_0 : i32, i32
  }
  func.func @transform_3(%arg0: i32) -> (i32, i32) {
    %c0_i32 = arith.constant 0 : i32
    %c0_i32_0 = arith.constant 0 : i32
    %c0_i32_1 = arith.constant 0 : i32
    return %c0_i32, %c0_i32_0 : i32, i32
  }
  func.func @transform_4(%arg0: i32) -> (i32, i32) {
    %c0_i32 = arith.constant 0 : i32
    %c0_i32_0 = arith.constant 0 : i32
    %c0_i32_1 = arith.constant 0 : i32
    return %c0_i32, %c0_i32_0 : i32, i32
  }
  func.func @transform_5(%arg0: i32) -> (i32, i32) {
    %c0_i32 = arith.constant 0 : i32
    %c0_i32_0 = arith.constant 0 : i32
    %c0_i32_1 = arith.constant 0 : i32
    return %c0_i32, %c0_i32_0 : i32, i32
  }
  func.func @transform_6(%arg0: i32) -> (i32, i32) {
    %c0_i32 = arith.constant 0 : i32
    %c0_i32_0 = arith.constant 0 : i32
    %c0_i32_1 = arith.constant 0 : i32
    return %c0_i32, %c0_i32_0 : i32, i32
  }
  func.func @transform_7(%arg0: i32) -> (i32, i32) {
    %c0_i32 = arith.constant 0 : i32
    %c0_i32_0 = arith.constant 0 : i32
    %c0_i32_1 = arith.constant 0 : i32
    return %c0_i32, %c0_i32_0 : i32, i32
  }
  func.func @transform_8(%arg0: i32) -> (i32, i32) {
    %c0_i32 = arith.constant 0 : i32
    %c0_i32_0 = arith.constant 0 : i32
    %c0_i32_1 = arith.constant 0 : i32
    return %c0_i32, %c0_i32_0 : i32, i32
  }
  func.func @transform_9(%arg0: i32) -> (i32, i32) {
    %c0_i32 = arith.constant 0 : i32
    %c0_i32_0 = arith.constant 0 : i32
    %c0_i32_1 = arith.constant 0 : i32
    return %c0_i32, %c0_i32_0 : i32, i32
  }
  func.func @transform_10(%arg0: i32) -> (i32, i32) {
    %c0_i32 = arith.constant 0 : i32
    %c0_i32_0 = arith.constant 0 : i32
    %c0_i32_1 = arith.constant 0 : i32
    return %c0_i32, %c0_i32_0 : i32, i32
  }
  func.func @transform_11(%arg0: i32) -> (i32, i32) {
    %c0_i32 = arith.constant 0 : i32
    %c0_i32_0 = arith.constant 0 : i32
    %c0_i32_1 = arith.constant 0 : i32
    return %c0_i32, %c0_i32_0 : i32, i32
  }
  func.func @transform_12(%arg0: i32) -> (i32, i32, i32) {
    %c0_i32 = arith.constant 0 : i32
    %c0_i32_0 = arith.constant 0 : i32
    %c0_i32_1 = arith.constant 0 : i32
    return %arg0, %c0_i32, %c0_i32_0 : i32, i32, i32
  }
  func.func @transform_13(%arg0: i32) -> (i32, i32, i32) {
    %c0_i32 = arith.constant 0 : i32
    %c0_i32_0 = arith.constant 0 : i32
    %c0_i32_1 = arith.constant 0 : i32
    return %arg0, %c0_i32, %c0_i32_0 : i32, i32, i32
  }
  func.func @transform_14(%arg0: i32) -> (i32, i32, i32) {
    %c0_i32 = arith.constant 0 : i32
    %c0_i32_0 = arith.constant 0 : i32
    %c0_i32_1 = arith.constant 0 : i32
    return %arg0, %c0_i32, %c0_i32_0 : i32, i32, i32
  }
  func.func @transform_15(%arg0: i32) -> (i32, i32, i32) {
    %c0_i32 = arith.constant 0 : i32
    %c0_i32_0 = arith.constant 0 : i32
    %c0_i32_1 = arith.constant 0 : i32
    return %arg0, %c0_i32, %c0_i32_0 : i32, i32, i32
  }
}

</mosaic_0001>

<bundles_post_ra>
// kernel: tpu_custom_call.1
= control target key start
LH: loop header
LB: loop body
LE: loop exit
PB: predicated region body
PF: predicated region fallthrough
CT: control target
= control target key end

     0   :  { %s2102_s0 = inlined_call_operand.vmem [shape: f32[1,64,32], index: 0, kind: input, shape index: {}]   ;;  %s2103_s1 = inlined_call_operand.vmem [shape: f32[32,128], index: 1, kind: input, shape index: {}]   ;;  %s2104_s2 = inlined_call_operand.vmem [shape: f32[1,128], index: 2, kind: input, shape index: {}]   ;;  %s2105_s3 = inlined_call_operand.vmem [shape: f32[32,128], index: 3, kind: input, shape index: {}]   ;;  %s2106_s4 = inlined_call_operand.vmem [shape: f32[32,6], index: 4, kind: input, shape index: {}]   ;;  %s2107_s5 = inlined_call_operand.vmem [shape: f32[1,6], index: 5, kind: input, shape index: {}]   ;;  %s2108_s6 = inlined_call_operand.vmem [shape: f32[1,6], index: 6, kind: input, shape index: {}]   ;;  %s2109_s7 = inlined_call_operand.vmem [shape: f32[1,6], index: 7, kind: input, shape index: {}]   ;;  %s2110_s8 = inlined_call_operand.vmem [shape: f32[6,6], index: 8, kind: input, shape index: {}]   ;;  %s2111_s9 = inlined_call_operand.vmem [shape: f32[6,6], index: 9, kind: input, shape index: {}]   ;;  %s2112_s10 = inlined_call_operand.vmem [shape: f32[1,6], index: 10, kind: input, shape index: {}]   ;;  %s2113_s11 = inlined_call_operand.vmem [shape: f32[8,64], index: 11, kind: input, shape index: {}]   ;;  %s2114_s12 = inlined_call_operand.vmem [shape: f32[1,64,6], index: 12, kind: input, shape index: {}]   ;;  %s2115_s13 = inlined_call_operand.vmem [shape: f32[1,8,6], index: 13, kind: input, shape index: {}]   ;;  %s2116_s14 = inlined_call_operand.vmem [shape: f32[1,64,1], index: 14, kind: input, shape index: {}]   ;;  %s2117_s15 = inlined_call_operand.hbm [shape: f32[1,1,8], index: 15, kind: output, shape index: {}]  }
   0x1   :  { %v80_v0 = vld [vmem:[%s2103_s1 + $0x18] sm:$0xff]  ;;  %v79_v1 = vld [vmem:[%s2103_s1 + $0x10] sm:$0xff]  ;;  %v78_v2 = vld [vmem:[%s2103_s1 + $0x8] sm:$0xff] }
   0x2   :  { %136 = vmatpush.msra.mxu0 %v80_v0  ;;  %v77_v3 = vld [vmem:[%s2103_s1] sm:$0xff] }
   0x4   :  { %137 = vmatpush.msra.mxu0 %v79_v1 }
   0x5   :  { %20 = vsyncpa [#allocation4], 0  ;;  %v51_v4 = vld [vmem:[%s2102_s0] sm:$0xff]  ;;  %vm99_vm0 = vcmask 261120   ;;  %v52_v5 = vld [vmem:[%s2102_s0 + $0x8] sm:$0xff]  ;;  %v1519_v12 = vmov 0.0   ;;  %v165_v23 = vlaneseq }
   0x6   :  { %138 = vmatpush.msra.mxu0 %v78_v2  ;;  %v53_v6 = vld [vmem:[%s2102_s0 + $0x10] sm:$0xff]  ;;  %v1631_v7 = vld [vmem:[%s2105_s3 + $0x18] sm:$0xff]  ;;  %v1650_v10 = vld [vmem:[%s2105_s3 + $0x8] sm:$0xff]  ;;  %vm248_vm6 = vcmask 130048   ;;  %vm250_vm7 = vcmask 261248   ;;  %s1320_s27 = sshll.u32 %s2117_s15, 4  ;;  %s1321_s27 = int_to_ptr.hbm [resolvable:$true] %s1320_s27 }
   0x7   :  { %v1636_v8 = vld [vmem:[%s2105_s3 + $0x10] sm:$0xff]  ;;  %198 = vmatpush.msra.mxu1 %v1631_v7  ;;  %267 = vmatpush.msra.mxu2 %v1631_v7  ;;  %v54_v9 = vld [vmem:[%s2102_s0 + $0x18] sm:$0xff]  ;;  %v1657_v11 = vld [vmem:[%s2105_s3] sm:$0xff]  ;;  %v1704_v25 = vand.u32 127, %v165_v23 }
   0x8   :  { %139 = vmatpush.msra.mxu0 %v77_v3  ;;  %334 = vmatpush.msra.mxu3 %v1631_v7  ;;  %v55_v13 = vld [vmem:[%s2102_s0 + $0x20] sm:$0xff]  ;;  %v56_v14 = vld [vmem:[%s2102_s0 + $0x28] sm:$0xff]  ;;  %v57_v15 = vld [vmem:[%s2102_s0 + $0x30] sm:$0xff] }
   0x9   :  { %1329 = vmatmul.msk.f32.vlgmr.msra.gmra.mxu0 %vm99_vm0, %v51_v4  ;;  %199 = vmatpush.msra.mxu1 %v1636_v8  ;;  %v58_v16 = vld [vmem:[%s2102_s0 + $0x38] sm:$0xff]  ;;  %v1392_v18 = vld [vmem:[%s2104_s2] ss:$0 sm:$0xff]  ;;  %v171_v27 = vand.u32 31, %v1704_v25  ;;  %s1520_s0 = smov 32   ;;  %s1521_s2 = smov 64  }
   0xa   :  { %268 = vmatpush.msra.mxu2 %v1636_v8  ;;  %335 = vmatpush.msra.mxu3 %v1636_v8 }
   0xb   :  { %200 = vmatpush.msra.mxu1 %v1650_v10  ;;  %vm1709_vm1 = vcmp.lt.s32.totalorder %v171_v27, 16 }
   0xc   :  { %269 = vmatpush.msra.mxu2 %v1650_v10  ;;  %336 = vmatpush.msra.mxu3 %v1650_v10 }
   0xd   :  { %201 = vmatpush.msra.mxu1 %v1657_v11 }
   0xe   :  { %202 = vmatmul.f32.vlgmr.msra.gmra.mxu1 %v1519_v12  ;;  %270 = vmatpush.msra.mxu2 %v1657_v11 }
   0xf   :  { %337 = vmatpush.msra.mxu3 %v1657_v11  ;;  %401 = vmatpush.msrb.mxu1 %v1631_v7 }
  0x10   :  { %468 = vmatpush.msrb.mxu2 %v1631_v7 }
  0x11   :  { %1330 = vmatmul.msk.f32.gmra.mxu0 %vm99_vm0, %v52_v5  ;;  %535 = vmatpush.msrb.mxu3 %v1631_v7 }
  0x12   :  { %402 = vmatpush.msrb.mxu1 %v1636_v8  ;;  %469 = vmatpush.msrb.mxu2 %v1636_v8 }
  0x13   :  { %536 = vmatpush.msrb.mxu3 %v1636_v8 }
  0x14   :  { %403 = vmatpush.msrb.mxu1 %v1650_v10  ;;  %470 = vmatpush.msrb.mxu2 %v1650_v10 }
  0x15   :  { %537 = vmatpush.msrb.mxu3 %v1650_v10 }
  0x16   :  { %404 = vmatpush.msrb.mxu1 %v1657_v11  ;;  %471 = vmatpush.msrb.mxu2 %v1657_v11 }
  0x17   :  { %538 = vmatpush.msrb.mxu3 %v1657_v11 }
  0x18   :  { %602 = vmatpush.msra.mxu1 %v1631_v7 }
  0x19   :  { %1331 = vmatmul.msk.f32.gmra.mxu0 %vm99_vm0, %v53_v6 }
  0x1a   :  { %603 = vmatpush.msra.mxu1 %v1636_v8 }
  0x1c   :  { %604 = vmatpush.msra.mxu1 %v1650_v10 }
  0x1e   :  { %605 = vmatpush.msra.mxu1 %v1657_v11 }
  0x21   :  { %1332 = vmatmul.msk.f32.gmra.mxu0 %vm99_vm0, %v54_v9 }
  0x29   :  { %1333 = vmatmul.msk.f32.gmra.mxu0 %vm99_vm0, %v55_v13 }
  0x31   :  { %1334 = vmatmul.msk.f32.gmra.mxu0 %vm99_vm0, %v56_v14 }
  0x39   :  { %1335 = vmatmul.msk.f32.gmra.mxu0 %vm99_vm0, %v57_v15 }
  0x41   :  { %1336 = vmatmul.msk.f32.gmra.mxu0 %vm99_vm0, %v58_v16 }
  0x86   :  { %v141_v17 = vpop.f32.mrf.mxu0 }
  0x87   :  { %v1743_v42 = vadd.f32 %v1392_v18, %v141_v17 }
  0x8b   :  { %v203_v44 = vpop.f32.mrf.mxu1 }
  0x8e   :  { %v144_v19 = vpop.f32.mrf.mxu0 }
  0x8f   :  { %v1699_v20 = vadd.f32 %v1392_v18, %v144_v19 }
  0x96   :  { %v147_v21 = vpop.f32.mrf.mxu0 }
  0x97   :  { %v1701_v22 = vadd.f32 %v1392_v18, %v147_v21 }
  0x9e   :  { %v150_v24 = vpop.f32.mrf.mxu0 }
  0x9f   :  { %v1706_v26 = vadd.f32 %v1392_v18, %v150_v24 }
  0xa6   :  { %v153_v28 = vpop.f32.mrf.mxu0 }
  0xa7   :  { %v1713_v30 = vadd.f32 %v1392_v18, %v153_v28 }
  0xa9   :  { %v386_v31 = vsel %vm1709_vm1, %v1706_v26, %v1713_v30  ;;  %v453_v32 = vsel %vm1709_vm1, %v1713_v30, %v1706_v26 }
  0xae   :  { %v156_v33 = vpop.f32.mrf.mxu0 }
  0xaf   :  { %v1723_v34 = vadd.f32 %v1392_v18, %v156_v33 }
  0xb1   :  { %v319_v35 = vsel %vm1709_vm1, %v1701_v22, %v1723_v34  ;;  %v520_v36 = vsel %vm1709_vm1, %v1723_v34, %v1701_v22 }
  0xb6   :  { %v159_v37 = vpop.f32.mrf.mxu0 }
  0xb7   :  { %v1733_v38 = vadd.f32 %v1392_v18, %v159_v37 }
  0xb9   :  { %v252_v39 = vsel %vm1709_vm1, %v1699_v20, %v1733_v38  ;;  %v587_v40 = vsel %vm1709_vm1, %v1733_v38, %v1699_v20 }
  0xbe   :  { %v162_v41 = vpop.f32.mrf.mxu0 }
  0xbf   :  { %v1745_v43 = vadd.f32 %v1392_v18, %v162_v41 }
  0xc1   :  { %v182_v45 = vsel %vm1709_vm1, %v1743_v42, %v1745_v43  ;;  %v654_v46 = vsel %vm1709_vm1, %v1745_v43, %v1743_v42 }
  0xc2   :  { %v206_v47 = vadd.f32 %v203_v44, %v182_v45 }
  0xc4   :  { %1397 = vtanh.f32 %v206_v47  ;;  %v1337_v49 = vmul.f32 -1.442695, %v206_v47 }
  0xc6   :  { %1399 = vpow2.f32 %v1337_v49 }
  0xca   :  { %v1398_v48 = vpop.eup %1397 }
  0xcb   :  { %229 = vrot.lane.b32.xlu0 %v1398_v48, %s1520_s0 }
  0xcc   :  { %v1400_v50 = vpop.eup %1399 }
  0xcd   :  { %v210_v51 = vadd.f32 1.0, %v1400_v50 }
  0xcf   :  { %1401 = vrcp.f32 %v210_v51  ;;  %v222_v57 = vand.u32 2147483648, %v210_v51  ;;  %vm216_vm3 = vweird.f32 %v210_v51  ;;  %v220_v58 = vand.u32 2147483647, %v210_v51 }
  0xd1   :  { %v223_v60 = vor.u32 1.1754944e-38, %v222_v57  ;;  %vm221_vm5 = vcmp.eq.f32.partialorder %v220_v58, 8.507059e+37 }
  0xd5   :  { %v1402_v52 = vpop.eup %1401 }
  0xd6   :  { %v212_v53 = vmul.f32 %v1402_v52, %v210_v51  ;;  %vm217_vm2 = vweird.f32 %v1402_v52 }
  0xd7   :  { %vm218_vm4 = vmor %vm216_vm3, %vm217_vm2 }
  0xd8   :  { %v213_v54 = vsub.f32 1.0, %v212_v53 }
  0xda   :  { %v214_v55 = vmul.f32 %v1402_v52, %v213_v54 }
  0xdc   :  { %v215_v56 = vadd.f32 %v1402_v52, %v214_v55 }
  0xde   :  { %v219_v59 = vsel %vm218_vm4, %v1402_v52, %v215_v56 }
  0xdf   :  { %v224_v62 = vsel %vm221_vm5, %v223_v60, %v219_v59 }
  0xe0   :  { %v227_v0 = vmul.f32 0.0, %v224_v62 }
 0x13d   :  { %v230_v61 = vpop.permute.xlu0 %229 }
 0x13e   :  { %v232_v63 = vmul.f32 %v230_v61, %v224_v62 }
 0x140   :  { %234 = vrot.lane.b32.xlu0 %v232_v63, %s1520_s0 }
 0x1b2   :  { %v235_v1 = vpop.permute.xlu0 %234 }
 0x1b3   :  { %v237_v2 = vadd.f32 %v235_v1, %v227_v0 }
 0x1b5   :  { %1403 = vtanh.f32 %v237_v2 }
 0x1bb   :  { %v1404_v3 = vpop.eup %1403 }
 0x1bc   :  { %240 = vrot.lane.b32.xlu1 %v1404_v3, %s1520_s0 }
 0x22e   :  { %v241_v4 = vpop.permute.xlu1 %240 }
 0x22f   :  { %v243_v5 = vmul.f32 %v241_v4, %v224_v62 }
 0x231   :  { %245 = vrot.lane.b32.xlu1 %v243_v5, %s1521_s2 }
 0x2a3   :  { %v246_v6 = vpop.permute.xlu1 %245 }
 0x2a4   :  { %249 = vst.msk [vmem:[#allocation2] sm:$0xff] %vm248_vm6, %v246_v6  ;;  %1338 = vmatmul.msk.f32.vlgmr.msra.gmra.mxu2 %vm99_vm0, %v246_v6 }
 0x2a5   :  { %251 = vst.msk [vmem:[#allocation2 + $0x38] sm:$0xff] %vm250_vm7, %v246_v6  ;;  %669 = vmatpush.msra.mxu2 %v1631_v7 }
 0x2a7   :  { %670 = vmatpush.msra.mxu2 %v1636_v8 }
 0x2a9   :  { %671 = vmatpush.msra.mxu2 %v1650_v10 }
 0x2ab   :  { %672 = vmatpush.msra.mxu2 %v1657_v11 }
 0x327   :  { %v272_v9 = vpop.f32.mrf.mxu2 }
 0x328   :  { %v275_v12 = vadd.f32 %v272_v9, %v252_v39 }
 0x32a   :  { %1405 = vtanh.f32 %v275_v12  ;;  %v1339_v14 = vmul.f32 -1.442695, %v275_v12 }
 0x32c   :  { %1407 = vpow2.f32 %v1339_v14 }
 0x330   :  { %v1406_v13 = vpop.eup %1405 }
 0x331   :  { %298 = vrot.lane.b32.xlu2 %v1406_v13, %s1520_s0 }
 0x332   :  { %v1408_v15 = vpop.eup %1407 }
 0x333   :  { %v279_v16 = vadd.f32 1.0, %v1408_v15 }
 0x335   :  { %1409 = vrcp.f32 %v279_v16  ;;  %v291_v10 = vand.u32 2147483648, %v279_v16  ;;  %vm285_vm9 = vweird.f32 %v279_v16  ;;  %v289_v11 = vand.u32 2147483647, %v279_v16 }
 0x337   :  { %v292_v24 = vor.u32 1.1754944e-38, %v291_v10  ;;  %vm290_vm11 = vcmp.eq.f32.partialorder %v289_v11, 8.507059e+37 }
 0x33b   :  { %v1410_v17 = vpop.eup %1409 }
 0x33c   :  { %v281_v18 = vmul.f32 %v1410_v17, %v279_v16  ;;  %vm286_vm8 = vweird.f32 %v1410_v17 }
 0x33d   :  { %vm287_vm10 = vmor %vm285_vm9, %vm286_vm8 }
 0x33e   :  { %v282_v7 = vsub.f32 1.0, %v281_v18 }
 0x340   :  { %v283_v19 = vmul.f32 %v1410_v17, %v282_v7 }
 0x342   :  { %v284_v8 = vadd.f32 %v1410_v17, %v283_v19 }
 0x344   :  { %v288_v21 = vsel %vm287_vm10, %v1410_v17, %v284_v8 }
 0x345   :  { %v293_v28 = vsel %vm290_vm11, %v292_v24, %v288_v21 }
 0x346   :  { %v296_v37 = vmul.f32 %v293_v28, %v237_v2 }
 0x38b   :  { %v299_v27 = vpop.permute.xlu2 %298 }
 0x38c   :  { %v301_v33 = vmul.f32 %v299_v27, %v293_v28 }
 0x38e   :  { %303 = vrot.lane.b32.xlu2 %v301_v33, %s1520_s0 }
 0x3e8   :  { %v304_v39 = vpop.permute.xlu2 %303 }
 0x3e9   :  { %v306_v41 = vadd.f32 %v304_v39, %v296_v37 }
 0x3eb   :  { %1411 = vtanh.f32 %v306_v41 }
 0x3f1   :  { %v1412_v44 = vpop.eup %1411 }
 0x3f2   :  { %309 = vrot.lane.b32.xlu0 %v1412_v44, %s1520_s0 }
 0x464   :  { %v310_v45 = vpop.permute.xlu0 %309 }
 0x465   :  { %v312_v47 = vmul.f32 %v310_v45, %v293_v28 }
 0x467   :  { %314 = vrot.lane.b32.xlu1 %v312_v47, %s1521_s2 }
 0x4d9   :  { %v315_v48 = vpop.permute.xlu1 %314 }
 0x4da   :  { %317 = vst.msk [vmem:[#allocation2 + $0x8] sm:$0xff] %vm248_vm6, %v315_v48  ;;  %1340 = vmatmul.msk.f32.vlgmr.msra.gmra.mxu3 %vm99_vm0, %v315_v48 }
 0x4db   :  { %318 = vst.msk [vmem:[#allocation2 + $0x30] sm:$0xff] %vm250_vm7, %v315_v48 }
 0x55d   :  { %v339_v49 = vpop.f32.mrf.mxu3 }
 0x55e   :  { %v342_v50 = vadd.f32 %v339_v49, %v319_v35 }
 0x560   :  { %1413 = vtanh.f32 %v342_v50  ;;  %v1341_v52 = vmul.f32 -1.442695, %v342_v50 }
 0x562   :  { %1415 = vpow2.f32 %v1341_v52 }
 0x566   :  { %v1414_v51 = vpop.eup %1413 }
 0x567   :  { %365 = vrot.lane.b32.xlu2 %v1414_v51, %s1520_s0 }
 0x568   :  { %v1416_v53 = vpop.eup %1415 }
 0x569   :  { %v346_v54 = vadd.f32 1.0, %v1416_v53 }
 0x56b   :  { %1417 = vrcp.f32 %v346_v54  ;;  %v358_v60 = vand.u32 2147483648, %v346_v54  ;;  %vm352_vm13 = vweird.f32 %v346_v54  ;;  %v356_v61 = vand.u32 2147483647, %v346_v54 }
 0x56d   :  { %v359_v62 = vor.u32 1.1754944e-38, %v358_v60  ;;  %vm357_vm15 = vcmp.eq.f32.partialorder %v356_v61, 8.507059e+37 }
 0x571   :  { %v1418_v55 = vpop.eup %1417 }
 0x572   :  { %v348_v56 = vmul.f32 %v1418_v55, %v346_v54  ;;  %vm353_vm12 = vweird.f32 %v1418_v55 }
 0x573   :  { %vm354_vm14 = vmor %vm352_vm13, %vm353_vm12 }
 0x574   :  { %v349_v57 = vsub.f32 1.0, %v348_v56 }
 0x576   :  { %v350_v58 = vmul.f32 %v1418_v55, %v349_v57 }
 0x578   :  { %v351_v59 = vadd.f32 %v1418_v55, %v350_v58 }
 0x57a   :  { %v355_v35 = vsel %vm354_vm14, %v1418_v55, %v351_v59 }
 0x57b   :  { %v360_v0 = vsel %vm357_vm15, %v359_v62, %v355_v35 }
 0x57c   :  { %v363_v2 = vmul.f32 %v360_v0, %v306_v41 }
 0x5c1   :  { %v366_v63 = vpop.permute.xlu2 %365 }
 0x5c2   :  { %v368_v1 = vmul.f32 %v366_v63, %v360_v0 }
 0x5c4   :  { %370 = vrot.lane.b32.xlu0 %v368_v1, %s1520_s0 }
 0x636   :  { %v371_v3 = vpop.permute.xlu0 %370 }
 0x637   :  { %v373_v4 = vadd.f32 %v371_v3, %v363_v2 }
 0x639   :  { %1419 = vtanh.f32 %v373_v4 }
 0x63f   :  { %v1420_v5 = vpop.eup %1419 }
 0x640   :  { %376 = vrot.lane.b32.xlu1 %v1420_v5, %s1520_s0 }
 0x6b2   :  { %v377_v6 = vpop.permute.xlu1 %376 }
 0x6b3   :  { %v379_v9 = vmul.f32 %v377_v6, %v360_v0 }
 0x6b5   :  { %381 = vrot.lane.b32.xlu2 %v379_v9, %s1521_s2 }
 0x70f   :  { %v382_v12 = vpop.permute.xlu2 %381 }
 0x710   :  { %384 = vst.msk [vmem:[#allocation2 + $0x10] sm:$0xff] %vm248_vm6, %v382_v12  ;;  %1342 = vmatmul.msk.f32.vlgmr.msrb.gmra.mxu1 %vm99_vm0, %v382_v12 }
 0x711   :  { %385 = vst.msk [vmem:[#allocation2 + $0x28] sm:$0xff] %vm250_vm7, %v382_v12 }
 0x78d   :  { %v406_v13 = vpop.f32.mrf.mxu1 }
 0x78e   :  { %v409_v14 = vadd.f32 %v406_v13, %v386_v31 }
 0x790   :  { %1421 = vtanh.f32 %v409_v14  ;;  %v1343_v16 = vmul.f32 -1.442695, %v409_v14 }
 0x792   :  { %1423 = vpow2.f32 %v1343_v16 }
 0x796   :  { %v1422_v15 = vpop.eup %1421 }
 0x797   :  { %432 = vrot.lane.b32.xlu0 %v1422_v15, %s1520_s0 }
 0x798   :  { %v1424_v17 = vpop.eup %1423 }
 0x799   :  { %v413_v18 = vadd.f32 1.0, %v1424_v17 }
 0x79b   :  { %1425 = vrcp.f32 %v413_v18  ;;  %v425_v21 = vand.u32 2147483648, %v413_v18  ;;  %vm419_vm3 = vweird.f32 %v413_v18  ;;  %v423_v24 = vand.u32 2147483647, %v413_v18 }
 0x79d   :  { %v426_v27 = vor.u32 1.1754944e-38, %v425_v21  ;;  %vm424_vm5 = vcmp.eq.f32.partialorder %v423_v24, 8.507059e+37 }
 0x7a1   :  { %v1426_v7 = vpop.eup %1425 }
 0x7a2   :  { %v415_v19 = vmul.f32 %v1426_v7, %v413_v18  ;;  %vm420_vm2 = vweird.f32 %v1426_v7 }
 0x7a3   :  { %vm421_vm4 = vmor %vm419_vm3, %vm420_vm2 }
 0x7a4   :  { %v416_v8 = vsub.f32 1.0, %v415_v19 }
 0x7a6   :  { %v417_v10 = vmul.f32 %v1426_v7, %v416_v8 }
 0x7a8   :  { %v418_v11 = vadd.f32 %v1426_v7, %v417_v10 }
 0x7aa   :  { %v422_v31 = vsel %vm421_vm4, %v1426_v7, %v418_v11 }
 0x7ab   :  { %v427_v33 = vsel %vm424_vm5, %v426_v27, %v422_v31 }
 0x7ac   :  { %v430_v39 = vmul.f32 %v427_v33, %v373_v4 }
 0x809   :  { %v433_v28 = vpop.permute.xlu0 %432 }
 0x80a   :  { %v435_v37 = vmul.f32 %v433_v28, %v427_v33 }
 0x80c   :  { %437 = vrot.lane.b32.xlu1 %v435_v37, %s1520_s0 }
 0x87e   :  { %v438_v41 = vpop.permute.xlu1 %437 }
 0x87f   :  { %v440_v44 = vadd.f32 %v438_v41, %v430_v39 }
 0x881   :  { %1427 = vtanh.f32 %v440_v44 }
 0x887   :  { %v1428_v45 = vpop.eup %1427 }
 0x888   :  { %443 = vrot.lane.b32.xlu2 %v1428_v45, %s1520_s0 }
 0x8e2   :  { %v444_v47 = vpop.permute.xlu2 %443 }
 0x8e3   :  { %v446_v48 = vmul.f32 %v444_v47, %v427_v33 }
 0x8e5   :  { %448 = vrot.lane.b32.xlu0 %v446_v48, %s1521_s2 }
 0x957   :  { %v449_v49 = vpop.permute.xlu0 %448 }
 0x958   :  { %451 = vst.msk [vmem:[#allocation2 + $0x18] sm:$0xff] %vm248_vm6, %v449_v49  ;;  %1344 = vmatmul.msk.f32.vlgmr.msrb.gmra.mxu2 %vm99_vm0, %v449_v49 }
 0x959   :  { %452 = vst.msk [vmem:[#allocation2 + $0x20] sm:$0xff] %vm250_vm7, %v449_v49 }
 0x9db   :  { %v473_v50 = vpop.f32.mrf.mxu2 }
 0x9dc   :  { %v476_v51 = vadd.f32 %v473_v50, %v453_v32 }
 0x9de   :  { %1429 = vtanh.f32 %v476_v51  ;;  %v1345_v53 = vmul.f32 -1.442695, %v476_v51 }
 0x9e0   :  { %1431 = vpow2.f32 %v1345_v53 }
 0x9e4   :  { %v1430_v52 = vpop.eup %1429 }
 0x9e5   :  { %499 = vrot.lane.b32.xlu1 %v1430_v52, %s1520_s0 }
 0x9e6   :  { %v1432_v54 = vpop.eup %1431 }
 0x9e7   :  { %v480_v55 = vadd.f32 1.0, %v1432_v54 }
 0x9e9   :  { %1433 = vrcp.f32 %v480_v55  ;;  %v492_v61 = vand.u32 2147483648, %v480_v55  ;;  %vm486_vm9 = vweird.f32 %v480_v55  ;;  %v490_v35 = vand.u32 2147483647, %v480_v55 }
 0x9eb   :  { %v493_v30 = vor.u32 1.1754944e-38, %v492_v61  ;;  %vm491_vm11 = vcmp.eq.f32.partialorder %v490_v35, 8.507059e+37 }
 0x9ef   :  { %v1434_v56 = vpop.eup %1433 }
 0x9f0   :  { %v482_v57 = vmul.f32 %v1434_v56, %v480_v55  ;;  %vm487_vm8 = vweird.f32 %v1434_v56 }
 0x9f1   :  { %vm488_vm10 = vmor %vm486_vm9, %vm487_vm8 }
 0x9f2   :  { %v483_v58 = vsub.f32 1.0, %v482_v57 }
 0x9f4   :  { %v484_v59 = vmul.f32 %v1434_v56, %v483_v58 }
 0x9f6   :  { %v485_v60 = vadd.f32 %v1434_v56, %v484_v59 }
 0x9f8   :  { %v489_v26 = vsel %vm488_vm10, %v1434_v56, %v485_v60 }
 0x9f9   :  { %v494_v62 = vsel %vm491_vm11, %v493_v30, %v489_v26  ;;  %vm908_vm11 = vcmask 1045504  }
 0x9fa   :  { %v497_v0 = vmul.f32 %v494_v62, %v440_v44 }
 0xa57   :  { %v500_v32 = vpop.permute.xlu1 %499 }
 0xa58   :  { %v502_v63 = vmul.f32 %v500_v32, %v494_v62 }
 0xa5a   :  { %504 = vrot.lane.b32.xlu2 %v502_v63, %s1520_s0 }
 0xab4   :  { %v505_v1 = vpop.permute.xlu2 %504 }
 0xab5   :  { %v507_v2 = vadd.f32 %v505_v1, %v497_v0 }
 0xab7   :  { %1435 = vtanh.f32 %v507_v2 }
 0xabd   :  { %v1436_v3 = vpop.eup %1435 }
 0xabe   :  { %510 = vrot.lane.b32.xlu0 %v1436_v3, %s1520_s0 }
 0xb30   :  { %v511_v4 = vpop.permute.xlu0 %510 }
 0xb31   :  { %v513_v5 = vmul.f32 %v511_v4, %v494_v62 }
 0xb33   :  { %515 = vrot.lane.b32.xlu1 %v513_v5, %s1521_s2 }
 0xba5   :  { %v516_v6 = vpop.permute.xlu1 %515 }
 0xba6   :  { %518 = vst.msk [vmem:[#allocation2 + $0x20] sm:$0xff] %vm248_vm6, %v516_v6  ;;  %1346 = vmatmul.msk.f32.vlgmr.msrb.gmra.mxu3 %vm99_vm0, %v516_v6 }
 0xba7   :  { %519 = vst.msk [vmem:[#allocation2 + $0x18] sm:$0xff] %vm250_vm7, %v516_v6 }
 0xc29   :  { %v540_v9 = vpop.f32.mrf.mxu3 }
 0xc2a   :  { %v543_v12 = vadd.f32 %v540_v9, %v520_v36 }
 0xc2c   :  { %1437 = vtanh.f32 %v543_v12  ;;  %v1347_v14 = vmul.f32 -1.442695, %v543_v12 }
 0xc2e   :  { %1439 = vpow2.f32 %v1347_v14 }
 0xc32   :  { %v1438_v13 = vpop.eup %1437 }
 0xc33   :  { %566 = vrot.lane.b32.xlu2 %v1438_v13, %s1520_s0 }
 0xc34   :  { %v1440_v15 = vpop.eup %1439 }
 0xc35   :  { %v547_v16 = vadd.f32 1.0, %v1440_v15 }
 0xc37   :  { %1441 = vrcp.f32 %v547_v16  ;;  %v559_v10 = vand.u32 2147483648, %v547_v16  ;;  %vm553_vm13 = vweird.f32 %v547_v16  ;;  %v557_v11 = vand.u32 2147483647, %v547_v16 }
 0xc39   :  { %v560_v34 = vor.u32 1.1754944e-38, %v559_v10  ;;  %vm558_vm15 = vcmp.eq.f32.partialorder %v557_v11, 8.507059e+37  ;;  %v1847_v10 = vld [vmem:[%s2114_s12] sm:$0xff] }
 0xc3d   :  { %v1442_v17 = vpop.eup %1441 }
 0xc3e   :  { %v549_v18 = vmul.f32 %v1442_v17, %v547_v16  ;;  %vm554_vm12 = vweird.f32 %v1442_v17 }
 0xc3f   :  { %vm555_vm14 = vmor %vm553_vm13, %vm554_vm12  ;;  %vm886_vm12 = vcmask 48128   ;;  %vm857_vm13 = vcmask 523264  }
 0xc40   :  { %v550_v7 = vsub.f32 1.0, %v549_v18 }
 0xc42   :  { %v551_v19 = vmul.f32 %v1442_v17, %v550_v7 }
 0xc44   :  { %v552_v8 = vadd.f32 %v1442_v17, %v551_v19 }
 0xc46   :  { %v556_v22 = vsel %vm555_vm14, %v1442_v17, %v552_v8  ;;  %v93_v8 = vld [vmem:[%s2110_s8] sm:$0x3f]  ;;  %vm964_vm14 = vcmask 457728  }
 0xc47   :  { %v561_v21 = vsel %vm558_vm15, %v560_v34, %v556_v22  ;;  %1361 = vmatpush.msk.msrb.mxu2 %vm908_vm11, %v93_v8  ;;  %v89_v34 = vld [vmem:[%s2106_s4 + $0x18] sm:$0xff] }
 0xc48   :  { %v564_v31 = vmul.f32 %v561_v21, %v507_v2  ;;  %768 = vmatpush.msra.mxu3 %v89_v34  ;;  %v66_v34 = vld [vmem:[%s2114_s12 + $0x38] sm:$0xff] }
 0xc8d   :  { %v567_v36 = vpop.permute.xlu2 %566 }
 0xc8e   :  { %v569_v24 = vmul.f32 %v567_v36, %v561_v21  ;;  %v88_v36 = vld [vmem:[%s2106_s4 + $0x10] sm:$0xff] }
 0xc8f   :  { %769 = vmatpush.msra.mxu3 %v88_v36 }
 0xc90   :  { %571 = vrot.lane.b32.xlu0 %v569_v24, %s1520_s0  ;;  %v87_v24 = vld [vmem:[%s2106_s4 + $0x8] sm:$0xff] }
 0xc91   :  { %770 = vmatpush.msra.mxu3 %v87_v24 }
 0xd02   :  { %v572_v27 = vpop.permute.xlu0 %571 }
 0xd03   :  { %v574_v28 = vadd.f32 %v572_v27, %v564_v31  ;;  %v86_v31 = vld [vmem:[%s2106_s4] sm:$0xff]  ;;  %v1875_v27 = vld [vmem:[%s2116_s14 + $0x28] sm:$0xff] }
 0xd04   :  { %771 = vmatpush.msra.mxu3 %v86_v31 }
 0xd05   :  { %1443 = vtanh.f32 %v574_v28 }
 0xd0b   :  { %v1444_v33 = vpop.eup %1443 }
 0xd0c   :  { %577 = vrot.lane.b32.xlu1 %v1444_v33, %s1520_s0  ;;  %v1522_v33 = vmov 0  }
 0xd0d   :  { %1391 = vset.pattern.permute.xlu1 %v1522_v33  ;;  %1390 = vset.pattern.permute.xlu0 %v1522_v33 }
 0xd0e   :  { %1389 = vset.pattern.permute.xlu2 %v1522_v33 }
 0xd7e   :  { %v578_v37 = vpop.permute.xlu1 %577 }
 0xd7f   :  { %v580_v39 = vmul.f32 %v578_v37, %v561_v21  ;;  %v1862_v21 = vld [vmem:[%s2114_s12 + $0x8] sm:$0xff]  ;;  %v71_v37 = vld [vmem:[%s2116_s14 + $0x18] sm:$0xff] }
 0xd81   :  { %582 = vrot.lane.b32.xlu2 %v580_v39, %s1521_s2  ;;  %v1894_v39 = vld [vmem:[%s2114_s12 + $0x18] sm:$0xff] }
 0xddb   :  { %v583_v41 = vpop.permute.xlu2 %582 }
 0xddc   :  { %585 = vst.msk [vmem:[#allocation2 + $0x28] sm:$0xff] %vm248_vm6, %v583_v41  ;;  %1348 = vmatmul.msk.f32.vlgmr.msra.gmra.mxu1 %vm99_vm0, %v583_v41 }
 0xddd   :  { %586 = vst.msk [vmem:[#allocation2 + $0x10] sm:$0xff] %vm250_vm7, %v583_v41  ;;  %v1901_v41 = vld [vmem:[%s2116_s14 + $0x30] sm:$0xff] }
 0xe59   :  { %v607_v44 = vpop.f32.mrf.mxu1 }
 0xe5a   :  { %v610_v45 = vadd.f32 %v607_v44, %v587_v40  ;;  %v68_v44 = vld [vmem:[%s2116_s14] sm:$0xff] }
 0xe5c   :  { %1445 = vtanh.f32 %v610_v45  ;;  %v1349_v48 = vmul.f32 -1.442695, %v610_v45  ;;  %v1909_v45 = vld [vmem:[%s2114_s12 + $0x20] sm:$0xff] }
 0xe5e   :  { %1447 = vpow2.f32 %v1349_v48  ;;  %v69_v48 = vld [vmem:[%s2116_s14 + $0x8] sm:$0xff] }
 0xe62   :  { %v1446_v47 = vpop.eup %1445 }
 0xe63   :  { %633 = vrot.lane.b32.xlu0 %v1446_v47, %s1520_s0 }
 0xe64   :  { %v1448_v49 = vpop.eup %1447 }
 0xe65   :  { %v614_v50 = vadd.f32 1.0, %v1448_v49  ;;  %v1922_v49 = vld [vmem:[%s2114_s12 + $0x28] sm:$0xff] }
 0xe67   :  { %1449 = vrcp.f32 %v614_v50  ;;  %v626_v56 = vand.u32 2147483648, %v614_v50  ;;  %vm620_vm3 = vweird.f32 %v614_v50  ;;  %v624_v57 = vand.u32 2147483647, %v614_v50 }
 0xe69   :  { %v627_v38 = vor.u32 1.1754944e-38, %v626_v56  ;;  %vm625_vm5 = vcmp.eq.f32.partialorder %v624_v57, 8.507059e+37  ;;  %v724_v56 = vld [vmem:[#allocation2 + $0x18] sm:$0xff]  ;;  %v70_v57 = vld [vmem:[%s2116_s14 + $0x10] sm:$0xff] }
 0xe6d   :  { %v1450_v51 = vpop.eup %1449 }
 0xe6e   :  { %v616_v52 = vmul.f32 %v1450_v51, %v614_v50  ;;  %vm621_vm2 = vweird.f32 %v1450_v51 }
 0xe6f   :  { %vm622_vm4 = vmor %vm620_vm3, %vm621_vm2  ;;  %vm1196_vm3 = vcmp.gt.f32.partialorder %v1875_v27, 0.5 }
 0xe70   :  { %v617_v53 = vsub.f32 1.0, %v616_v52 }
 0xe72   :  { %v618_v54 = vmul.f32 %v1450_v51, %v617_v53  ;;  %v1938_v53 = vld [vmem:[%s2116_s14 + $0x38] sm:$0xff] }
 0xe74   :  { %v619_v55 = vadd.f32 %v1450_v51, %v618_v54  ;;  %v723_v54 = vld [vmem:[#allocation2 + $0x10] sm:$0xff] }
 0xe76   :  { %v623_v20 = vsel %vm622_vm4, %v1450_v51, %v619_v55  ;;  %v1930_v51 = vld [vmem:[%s2114_s12 + $0x30] sm:$0xff]  ;;  %v1945_v55 = vld [vmem:[%s2116_s14 + $0x20] sm:$0xff]  ;;  %vm1237_vm4 = vcmp.gt.f32.partialorder %v1901_v41, 0.5 }
 0xe77   :  { %v628_v58 = vsel %vm625_vm5, %v627_v38, %v623_v20  ;;  %v725_v38 = vld [vmem:[#allocation2 + $0x20] sm:$0xff] }
 0xe78   :  { %v631_v60 = vmul.f32 %v628_v58, %v574_v28  ;;  %v1880_v28 = vld [vmem:[%s2114_s12 + $0x10] sm:$0xff] }
 0xed5   :  { %v634_v40 = vpop.permute.xlu0 %633 }
 0xed6   :  { %v636_v59 = vmul.f32 %v634_v40, %v628_v58 }
 0xed8   :  { %638 = vrot.lane.b32.xlu1 %v636_v59, %s1520_s0 }
 0xf4a   :  { %v639_v61 = vpop.permute.xlu1 %638 }
 0xf4b   :  { %v641_v35 = vadd.f32 %v639_v61, %v631_v60  ;;  %v1393_v61 = vld [vmem:[%s2107_s5] ss:$0 sm:$0xff] }
 0xf4d   :  { %1451 = vtanh.f32 %v641_v35 }
 0xf53   :  { %v1452_v26 = vpop.eup %1451 }
 0xf54   :  { %644 = vrot.lane.b32.xlu2 %v1452_v26, %s1520_s0 }
 0xfae   :  { %v645_v30 = vpop.permute.xlu2 %644 }
 0xfaf   :  { %v647_v32 = vmul.f32 %v645_v30, %v628_v58  ;;  %v726_v58 = vld [vmem:[#allocation2 + $0x28] sm:$0xff] }
 0xfb1   :  { %649 = vrot.lane.b32.xlu0 %v647_v32, %s1521_s2 }
0x1023   :  { %v650_v62 = vpop.permute.xlu0 %649 }
0x1024   :  { %652 = vst.msk [vmem:[#allocation2 + $0x30] sm:$0xff] %vm248_vm6, %v650_v62  ;;  %1350 = vmatmul.msk.f32.vlgmr.msra.gmra.mxu2 %vm99_vm0, %v650_v62 }
0x1025   :  { %653 = vst.msk [vmem:[#allocation2 + $0x8] sm:$0xff] %vm250_vm7, %v650_v62 }
0x102b   :  { %v727_v59 = vld [vmem:[#allocation2 + $0x30] sm:$0xff] }
0x102c   :  { %1362 = vmatmul.msk.f32.vlgmr.msrb.gmra.mxu2 %vm886_vm12, %v1847_v10  ;;  %v722_v52 = vld [vmem:[#allocation2 + $0x8] sm:$0xff] }
0x1034   :  { %1363 = vmatmul.msk.f32.gmra.mxu2 %vm886_vm12, %v1862_v21 }
0x103c   :  { %1364 = vmatmul.msk.f32.gmra.mxu2 %vm886_vm12, %v1880_v28 }
0x1044   :  { %1365 = vmatmul.msk.f32.gmra.mxu2 %vm886_vm12, %v1894_v39 }
0x104c   :  { %1366 = vmatmul.msk.f32.gmra.mxu2 %vm886_vm12, %v1909_v45 }
0x1054   :  { %1367 = vmatmul.msk.f32.gmra.mxu2 %vm886_vm12, %v1922_v49 }
0x105c   :  { %1368 = vmatmul.msk.f32.gmra.mxu2 %vm886_vm12, %v1930_v51 }
0x10a7   :  { %v674_v63 = vpop.f32.mrf.mxu2 }
0x10a8   :  { %v677_v0 = vadd.f32 %v674_v63, %v654_v46 }
0x10aa   :  { %1453 = vtanh.f32 %v677_v0  ;;  %v1351_v2 = vmul.f32 -1.442695, %v677_v0 }
0x10ac   :  { %1455 = vpow2.f32 %v1351_v2 }
0x10af   :  { %v1971_v0 = vpop.f32.mrf.mxu2 }
0x10b0   :  { %v1454_v1 = vpop.eup %1453 }
0x10b1   :  { %700 = vrot.lane.b32.xlu1 %v1454_v1, %s1520_s0 }
0x10b2   :  { %v1456_v3 = vpop.eup %1455 }
0x10b3   :  { %v681_v4 = vadd.f32 1.0, %v1456_v3 }
0x10b5   :  { %1457 = vrcp.f32 %v681_v4  ;;  %v693_v29 = vand.u32 2147483648, %v681_v4  ;;  %vm687_vm9 = vweird.f32 %v681_v4  ;;  %v691_v14 = vand.u32 2147483647, %v681_v4 }
0x10b7   :  { %v694_v43 = vor.u32 1.1754944e-38, %v693_v29  ;;  %vm692_vm10 = vcmp.eq.f32.partialorder %v691_v14, 8.507059e+37  ;;  %v1973_v2 = vpop.f32.mrf.mxu2 }
0x10bb   :  { %v1458_v5 = vpop.eup %1457 }
0x10bc   :  { %v683_v6 = vmul.f32 %v1458_v5, %v681_v4  ;;  %vm688_vm8 = vweird.f32 %v1458_v5 }
0x10bd   :  { %vm689_vm1 = vmor %vm687_vm9, %vm688_vm8  ;;  %vm1155_vm8 = vcmp.gt.f32.partialorder %v1945_v55, 0.5 }
0x10be   :  { %v684_v9 = vsub.f32 1.0, %v683_v6 }
0x10c0   :  { %v685_v12 = vmul.f32 %v1458_v5, %v684_v9 }
0x10c2   :  { %v686_v13 = vadd.f32 %v1458_v5, %v685_v12 }
0x10c4   :  { %v690_v42 = vsel %vm689_vm1, %v1458_v5, %v686_v13  ;;  %v935_v5 = vpop.f32.mrf.mxu2  ;;  %vm1278_vm1 = vcmp.gt.f32.partialorder %v1938_v53, 0.5 }
0x10c5   :  { %v695_v15 = vsel %vm692_vm10, %v694_v43, %v690_v42 }
0x10c6   :  { %v698_v17 = vmul.f32 %v695_v15, %v641_v35  ;;  %v1964_v35 = vld [vmem:[%s2108_s6] ss:$0 sm:$0xff] }
0x10cc   :  { %v938_v9 = vpop.f32.mrf.mxu2 }
0x10d4   :  { %v941_v42 = vpop.f32.mrf.mxu2 }
0x1123   :  { %v701_v46 = vpop.permute.xlu1 %700 }
0x1124   :  { %v703_v16 = vmul.f32 %v701_v46, %v695_v15 }
0x1126   :  { %705 = vrot.lane.b32.xlu2 %v703_v16, %s1520_s0 }
0x112e   :  { %834 = vperm.xlu2 %1389, %v1938_v53  }
0x1136   :  { %819 = vperm.xlu2 %1389, %v1945_v55  }
0x113e   :  { %809 = vperm.xlu2 %1389, %v70_v57  }
0x1180   :  { %v706_v18 = vpop.permute.xlu2 %705 }
0x1181   :  { %v708_v7 = vadd.f32 %v706_v18, %v698_v17 }
0x1183   :  { %1459 = vtanh.f32 %v708_v7 }
0x1188   :  { %v835_v13 = vpop.permute.xlu2 %834 }
0x1189   :  { %v1460_v19 = vpop.eup %1459 }
0x118a   :  { %711 = vrot.lane.b32.xlu0 %v1460_v19, %s1520_s0  ;;  %v944_v19 = vpop.f32.mrf.mxu2 }
0x1190   :  { %v820_v43 = vpop.permute.xlu2 %819 }
0x1192   :  { %829 = vperm.xlu0 %1390, %v1901_v41  }
0x119a   :  { %804 = vperm.xlu0 %1390, %v69_v48  }
0x11fc   :  { %v712_v11 = vpop.permute.xlu0 %711 }
0x11fd   :  { %v714_v22 = vmul.f32 %v712_v11, %v695_v15 }
0x11ff   :  { %716 = vrot.lane.b32.xlu1 %v714_v22, %s1521_s2 }
0x1204   :  { %v830_v15 = vpop.permute.xlu0 %829 }
0x1207   :  { %824 = vperm.xlu1 %1391, %v1875_v27  }
0x120f   :  { %814 = vperm.xlu1 %1391, %v71_v37  }
0x1217   :  { %799 = vperm.xlu1 %1391, %v68_v44  }
0x1271   :  { %v717_v47 = vpop.permute.xlu1 %716 }
0x1272   :  { %719 = vst.msk [vmem:[#allocation2 + $0x38] sm:$0xff] %vm248_vm6, %v717_v47  ;;  %vm1032_vm6 = vcmp.gt.f32.partialorder %v69_v48, 0.5  ;;  %v810_v48 = vpop.permute.xlu2 %809 }
0x1273   :  { %720 = vst.msk [vmem:[#allocation2] sm:$0xff] %vm250_vm7, %v717_v47  ;;  %v1033_v20 = vsel %vm1032_vm6, 1, %v1522_v33  ;;  %vm1073_vm7 = vcmp.gt.f32.partialorder %v70_v57, 0.5 }
0x1274   :  { %1035 = vperm.xlu0 %1390, %v1033_v20   ;;  %v1074_v40 = vsel %vm1073_vm7, 1, %v1522_v33 }
0x1279   :  { %v728_v60 = vld [vmem:[#allocation2 + $0x38] sm:$0xff]  ;;  %v825_v29 = vpop.permute.xlu1 %824 }
0x127a   :  { %v721_v50 = vld [vmem:[#allocation2] sm:$0xff] }
0x127b   :  { %1352 = vmatmul.msk.f32.vlgmr.msra.gmra.mxu3 %vm99_vm0, %v721_v50 }
0x127c   :  { %1076 = vperm.xlu0 %1390, %v1074_v40  }
0x1281   :  { %v815_v7 = vpop.permute.xlu1 %814 }
0x1283   :  { %1353 = vmatmul.msk.f32.gmra.mxu3 %vm99_vm0, %v722_v52 }
0x128b   :  { %1354 = vmatmul.msk.f32.gmra.mxu3 %vm99_vm0, %v723_v54 }
0x1293   :  { %1355 = vmatmul.msk.f32.gmra.mxu3 %vm99_vm0, %v724_v56  ;;  %v805_v56 = vpop.permute.xlu0 %804 }
0x129b   :  { %1356 = vmatmul.msk.f32.gmra.mxu3 %vm99_vm0, %v725_v38  ;;  %v800_v38 = vpop.permute.xlu1 %799 }
0x12a3   :  { %1357 = vmatmul.msk.f32.gmra.mxu3 %vm99_vm0, %v726_v58  ;;  %v947_v58 = vpop.f32.mrf.mxu2 }
0x12ab   :  { %1358 = vmatmul.msk.f32.gmra.mxu3 %vm99_vm0, %v727_v59 }
0x12b3   :  { %1359 = vmatmul.msk.f32.gmra.mxu3 %vm99_vm0, %v728_v60  ;;  %vm1114_vm0 = vcmp.gt.f32.partialorder %v71_v37, 0.5 }
0x12b4   :  { %v1115_v4 = vsel %vm1114_vm0, 1, %v1522_v33  ;;  %vm1303_vm0 = vcmask 64512  }
0x12fe   :  { %v773_v26 = vpop.f32.mrf.mxu3 }
0x12ff   :  { %v774_v30 = vadd.f32 %v1393_v61, %v773_v26  ;;  %v955_v26 = vmul.f32 %v944_v19, %v1930_v51 }
0x1301   :  { %v1967_v32 = vadd.f32 %v1964_v35, %v774_v30  ;;  %v837_v60 = vmul.f32 %v800_v38, %v774_v30  ;;  %v76_v30 = vld [vmem:[%s2113_s11] sm:$0xff] }
0x1303   :  { %v992_v62 = vsel %vm886_vm12, %v1967_v32, -inf }
0x1304   :  { %993 = vmax.xlane.f32.xlu2 %v992_v62  ;;  %v956_v62 = vmul.f32 %v947_v58, %v66_v34 }
0x1306   :  { %v776_v63 = vpop.f32.mrf.mxu3 }
0x1307   :  { %v1996_v50 = vadd.f32 %v1393_v61, %v776_v63 }
0x1309   :  { %v838_v40 = vmul.f32 %v805_v56, %v1996_v50 }
0x130b   :  { %v846_v63 = vmul.f32 %v838_v40, %v1862_v21 }
0x130e   :  { %v779_v1 = vpop.f32.mrf.mxu3 }
0x130f   :  { %v1992_v37 = vadd.f32 %v1393_v61, %v779_v1  ;;  %v954_v1 = vmul.f32 %v941_v42, %v1922_v49 }
0x1311   :  { %v839_v57 = vmul.f32 %v810_v48, %v1992_v37 }
0x1316   :  { %v782_v3 = vpop.f32.mrf.mxu3 }
0x1317   :  { %v1989_v36 = vadd.f32 %v1393_v61, %v782_v3  ;;  %v845_v3 = vmul.f32 %v837_v60, %v1847_v10 }
0x1319   :  { %v840_v52 = vmul.f32 %v815_v7, %v1989_v36 }
0x131b   :  { %v848_v59 = vmul.f32 %v840_v52, %v1894_v39 }
0x131c   :  { %1117 = vperm.xlu2 %1389, %v1115_v4   ;;  %v962_v4 = vmul.f32 %v955_v26, %v830_v15 }
0x131e   :  { %v785_v6 = vpop.f32.mrf.mxu3 }
0x131f   :  { %v1982_v8 = vadd.f32 %v1393_v61, %v785_v6  ;;  %v963_v6 = vmul.f32 %v956_v62, %v835_v13 }
0x1321   :  { %v841_v44 = vmul.f32 %v820_v43, %v1982_v8 }
0x1323   :  { %v849_v20 = vmul.f32 %v841_v44, %v1909_v45 }
0x1326   :  { %v788_v12 = vpop.f32.mrf.mxu3 }
0x1327   :  { %v1978_v17 = vadd.f32 %v1393_v61, %v788_v12  ;;  %v953_v12 = vmul.f32 %v938_v9, %v1909_v45 }
0x1329   :  { %v842_v24 = vmul.f32 %v825_v29, %v1978_v17  ;;  %v960_v42 = vmul.f32 %v953_v12, %v820_v43 }
0x132b   :  { %v850_v54 = vmul.f32 %v842_v24, %v1922_v49  ;;  %v951_v49 = vmul.f32 %v1973_v2, %v1880_v28  ;;  %v856_v2 = vmul.f32 %v1964_v35, %v1847_v10  ;;  %v2051_v10 = vld [vmem:[%s2112_s10] ss:$0 sm:$0xff] }
0x132e   :  { %v791_v14 = vpop.f32.mrf.mxu3 }
0x132f   :  { %v1976_v46 = vadd.f32 %v1393_v61, %v791_v14  ;;  %v952_v14 = vmul.f32 %v935_v5, %v1894_v39  ;;  %v2021_v39 = vld [vmem:[%s2111_s9] sm:$0x3f] }
0x1330   :  { %1374 = vmatpush.msk.msrb.mxu0 %vm908_vm11, %v2021_v39  ;;  %v2040_v5 = vld [vmem:[%s2109_s7] ss:$0 sm:$0xff]  ;;  %s1523_s7 = smov [#allocation3]  }
0x1331   :  { %v843_v11 = vmul.f32 %v830_v15, %v1976_v46  ;;  %v959_v15 = vmul.f32 %v952_v14, %v815_v7  ;;  %s1318_s10 = sshll.u32 %s1523_s7, 4  ;;  %s1319_s10 = int_to_ptr.vmem [resolvable:$true] %s1318_s10 }
0x1332   :  { %1378 = vmatpush.msk.msra.mxu0 %vm908_vm11, %v2021_v39 }
0x1333   :  { %v851_v47 = vmul.f32 %v843_v11, %v1930_v51  ;;  %v961_v51 = vmul.f32 %v954_v1, %v825_v29  ;;  %v67_v29 = vld [vmem:[%s2115_s13] sm:$0xff]  ;;  %v1197_v1 = vsel %vm1196_vm3, 1, %v1522_v33 }
0x1334   :  { %v884_v7 = vmul.f32 %v2040_v5, %v67_v29 }
0x1336   :  { %v794_v16 = vpop.f32.mrf.mxu3 }
0x1337   :  { %v1980_v18 = vadd.f32 %v1393_v61, %v794_v16  ;;  %v847_v61 = vmul.f32 %v839_v57, %v1880_v28  ;;  %v958_v16 = vmul.f32 %v951_v49, %v810_v48  ;;  %v1036_v48 = vpop.permute.xlu0 %1035 }
0x1338   :  { %vm1037_vm15 = vcmp.eq.s32.totalorder %v1036_v48, 1 }
0x1339   :  { %v844_v22 = vmul.f32 %v835_v13, %v1980_v18  ;;  %v950_v13 = vmul.f32 %v1971_v0, %v1862_v21 }
0x133b   :  { %v852_v31 = vmul.f32 %v844_v22, %v66_v34  ;;  %v957_v19 = vmul.f32 %v950_v13, %v805_v56 }
0x133d   :  { %869 = vmatpush.msrb.mxu1 %v852_v31 }
0x133f   :  { %870 = vmatpush.msrb.mxu1 %v851_v47  ;;  %v1077_v60 = vpop.permute.xlu0 %1076 }
0x1340   :  { %vm1078_vm2 = vcmp.eq.s32.totalorder %v1077_v60, 1 }
0x1341   :  { %871 = vmatpush.msrb.mxu1 %v850_v54 }
0x1343   :  { %872 = vmatpush.msrb.mxu1 %v849_v20 }
0x1345   :  { %873 = vmatpush.msrb.mxu1 %v848_v59 }
0x1347   :  { %874 = vmatpush.msrb.mxu1 %v847_v61 }
0x1349   :  { %875 = vmatpush.msrb.mxu1 %v846_v63 }
0x134b   :  { %876 = vmatpush.msrb.mxu1 %v845_v3 }
0x134c   :  { %1360 = vmatmul.msk.f32.vlgmr.msrb.gmra.mxu1 %vm857_vm13, %v76_v30 }
0x134d   :  { %976 = vmatpush.msra.mxu1 %v963_v6 }
0x134f   :  { %977 = vmatpush.msra.mxu1 %v962_v4 }
0x1351   :  { %978 = vmatpush.msra.mxu1 %v961_v51 }
0x1353   :  { %979 = vmatpush.msra.mxu1 %v960_v42 }
0x1355   :  { %980 = vmatpush.msra.mxu1 %v959_v15 }
0x1357   :  { %981 = vmatpush.msra.mxu1 %v958_v16  ;;  %v1156_v16 = vsel %vm1155_vm8, 1, %v1522_v33 }
0x1359   :  { %982 = vmatpush.msra.mxu1 %v957_v19 }
0x135a   :  { %1369 = vmatmul.msk.f32.vlgmr.msra.gmra.mxu1 %vm964_vm14, %v76_v30 }
0x135b   :  { %1370 = vmatpush.msk.msrb.mxu1 %vm908_vm11, %v2021_v39 }
0x135d   :  { %1372 = vmatpush.msk.msra.mxu1 %vm908_vm11, %v2021_v39 }
0x1377   :  { %v994_v21 = vpop.xlane.xlu2 %993 }
0x1378   :  { %v995_v28 = vsub.f32 %v1967_v32, %v994_v21  ;;  %v1024_v35 = vadd.f32 %v994_v21, %v1996_v50 }
0x137a   :  { %v996_v45 = vmul.f32 1.442695, %v995_v28  ;;  %v1028_v44 = vadd.f32 %v2051_v10, %v1024_v35 }
0x137c   :  { %1461 = vpow2.f32 %v996_v45 }
0x137f   :  { %v1118_v14 = vpop.permute.xlu2 %1117 }
0x1380   :  { %vm1119_vm5 = vcmp.eq.s32.totalorder %v1118_v14, 1 }
0x1382   :  { %v1462_v0 = vpop.eup %1461 }
0x1383   :  { %1371 = vmatmul.msk.f32.vlgmr.msrb.gmra.mxu1 %vm886_vm12, %v1462_v0 }
0x1384   :  { %1376 = vmatpush.msk.msrb.mxu1 %vm908_vm11, %v2021_v39 }
0x13c9   :  { %v878_v9 = vpop.f32.mrf.mxu1 }
0x13ca   :  { %v879_v43 = vadd.f32 %v878_v9, %v856_v2 }
0x13cc   :  { %v885_v11 = vadd.f32 %v884_v7, %v879_v43 }
0x13d7   :  { %v984_v22 = vpop.f32.mrf.mxu1 }
0x13d8   :  { %v2046_v34 = vadd.f32 %v984_v22, %v885_v11  ;;  %v1279_v11 = vsel %vm1278_vm1, 1, %v1522_v33 }
0x1400   :  { %v1021_v24 = vpop.f32.mrf.mxu1 }
0x1401   :  { %1463 = vlog2.f32 %v1021_v24 }
0x1407   :  { %v1464_v31 = vpop.eup %1463 }
0x1408   :  { %v1030_v47 = vmul.f32 0.6931472, %v1464_v31 }
0x140a   :  { %v1031_v52 = vadd.f32 %v1030_v47, %v1028_v44 }
0x140c   :  { %v1038_v54 = vsel %vm1037_vm15, %v1031_v52, %v1967_v32 }
0x140d   :  { %v1039_v56 = vsel %vm886_vm12, %v1038_v54, -inf }
0x140e   :  { %1040 = vmax.xlane.f32.xlu1 %v1039_v56 }
0x1481   :  { %v1041_v57 = vpop.xlane.xlu1 %1040 }
0x1482   :  { %v1042_v20 = vsub.f32 %v1038_v54, %v1041_v57  ;;  %v1068_v58 = vadd.f32 %v1041_v57, %v1992_v37  ;;  %v1238_v37 = vsel %vm1237_vm4, 1, %v1522_v33 }
0x1484   :  { %v1043_v38 = vmul.f32 1.442695, %v1042_v20  ;;  %v1069_v32 = vadd.f32 %v2051_v10, %v1068_v58 }
0x1486   :  { %1465 = vpow2.f32 %v1043_v38 }
0x148c   :  { %v1466_v40 = vpop.eup %1465 }
0x148d   :  { %1373 = vmatmul.msk.f32.vlgmr.msra.gmra.mxu1 %vm886_vm12, %v1466_v40 }
0x148e   :  { %1380 = vmatpush.msk.msra.mxu1 %vm908_vm11, %v2021_v39 }
0x150a   :  { %v1065_v50 = vpop.f32.mrf.mxu1 }
0x150b   :  { %1467 = vlog2.f32 %v1065_v50 }
0x1511   :  { %v1468_v59 = vpop.eup %1467 }
0x1512   :  { %v1071_v61 = vmul.f32 0.6931472, %v1468_v59 }
0x1514   :  { %v1072_v26 = vadd.f32 %v1071_v61, %v1069_v32 }
0x1516   :  { %v1079_v62 = vsel %vm1078_vm2, %v1072_v26, %v1038_v54 }
0x1517   :  { %v1080_v63 = vsel %vm886_vm12, %v1079_v62, -inf }
0x1518   :  { %1081 = vmax.xlane.f32.xlu0 %v1080_v63 }
0x152c   :  { %1199 = vperm.xlu0 %1390, %v1197_v1  }
0x1534   :  { %1240 = vperm.xlu0 %1390, %v1238_v37  }
0x158b   :  { %v1082_v3 = vpop.xlane.xlu0 %1081 }
0x158c   :  { %v1083_v4 = vsub.f32 %v1079_v62, %v1082_v3  ;;  %v1109_v27 = vadd.f32 %v1082_v3, %v1989_v36 }
0x158e   :  { %v1084_v6 = vmul.f32 1.442695, %v1083_v4  ;;  %v1110_v41 = vadd.f32 %v2051_v10, %v1109_v27 }
0x1590   :  { %1469 = vpow2.f32 %v1084_v6 }
0x1596   :  { %v1470_v30 = vpop.eup %1469 }
0x1597   :  { %1375 = vmatmul.msk.f32.vlgmr.msrb.gmra.mxu0 %vm886_vm12, %v1470_v30 }
0x1598   :  { %1382 = vmatpush.msk.msrb.mxu0 %vm908_vm11, %v2021_v39 }
0x159e   :  { %v1200_v48 = vpop.permute.xlu0 %1199 }
0x159f   :  { %vm1201_vm10 = vcmp.eq.s32.totalorder %v1200_v48, 1 }
0x15a6   :  { %v1241_v59 = vpop.permute.xlu0 %1240 }
0x15a7   :  { %vm1242_vm11 = vcmp.eq.s32.totalorder %v1241_v59, 1 }
0x1614   :  { %v1106_v12 = vpop.f32.mrf.mxu0 }
0x1615   :  { %1471 = vlog2.f32 %v1106_v12 }
0x161b   :  { %v1472_v51 = vpop.eup %1471 }
0x161c   :  { %v1112_v49 = vmul.f32 0.6931472, %v1472_v51 }
0x161e   :  { %v1113_v42 = vadd.f32 %v1112_v49, %v1110_v41 }
0x1620   :  { %v1120_v13 = vsel %vm1119_vm5, %v1113_v42, %v1079_v62  ;;  %v988_v42 = vsel %vm886_vm12, %v2046_v34, 0.0 }
0x1621   :  { %v1121_v15 = vsel %vm886_vm12, %v1120_v13, -inf }
0x1622   :  { %1122 = vmax.xlane.f32.xlu1 %v1121_v15 }
0x163b   :  { %1158 = vperm.xlu1 %1391, %v1156_v16  }
0x1695   :  { %v1123_v19 = vpop.xlane.xlu1 %1122 }
0x1696   :  { %v1124_v39 = vsub.f32 %v1120_v13, %v1123_v19  ;;  %v1150_v45 = vadd.f32 %v1123_v19, %v1982_v8 }
0x1698   :  { %v1125_v21 = vmul.f32 1.442695, %v1124_v39  ;;  %v1151_v2 = vadd.f32 %v2051_v10, %v1150_v45 }
0x169a   :  { %1473 = vpow2.f32 %v1125_v21 }
0x16a0   :  { %v1474_v36 = vpop.eup %1473 }
0x16a1   :  { %1377 = vmatmul.msk.f32.vlgmr.msrb.gmra.mxu1 %vm886_vm12, %v1474_v36 }
0x16ad   :  { %v1159_v9 = vpop.permute.xlu1 %1158 }
0x16ae   :  { %vm1160_vm9 = vcmp.eq.s32.totalorder %v1159_v9, 1 }
0x171e   :  { %v1147_v28 = vpop.f32.mrf.mxu1 }
0x171f   :  { %1475 = vlog2.f32 %v1147_v28 }
0x1725   :  { %v1476_v0 = vpop.eup %1475 }
0x1726   :  { %v1153_v29 = vmul.f32 0.6931472, %v1476_v0 }
0x1728   :  { %v1154_v55 = vadd.f32 %v1153_v29, %v1151_v2 }
0x172a   :  { %v1161_v43 = vsel %vm1160_vm9, %v1154_v55, %v1120_v13 }
0x172b   :  { %v1162_v7 = vsel %vm886_vm12, %v1161_v43, -inf }
0x172c   :  { %1163 = vmax.xlane.f32.xlu2 %v1162_v7 }
0x1744   :  { %1281 = vperm.xlu2 %1389, %v1279_v11  }
0x179f   :  { %v1164_v22 = vpop.xlane.xlu2 %1163 }
0x17a0   :  { %v1165_v24 = vsub.f32 %v1161_v43, %v1164_v22  ;;  %v1191_v44 = vadd.f32 %v1164_v22, %v1978_v17 }
0x17a2   :  { %v1166_v35 = vmul.f32 1.442695, %v1165_v24  ;;  %v1192_v52 = vadd.f32 %v2051_v10, %v1191_v44 }
0x17a4   :  { %1477 = vpow2.f32 %v1166_v35 }
0x17a7   :  { %v1282_v30 = vpop.permute.xlu2 %1281 }
0x17a8   :  { %vm1283_vm6 = vcmp.eq.s32.totalorder %v1282_v30, 1 }
0x17aa   :  { %v1478_v8 = vpop.eup %1477 }
0x17ab   :  { %1379 = vmatmul.msk.f32.vlgmr.msra.gmra.mxu0 %vm886_vm12, %v1478_v8 }
0x1828   :  { %v1188_v31 = vpop.f32.mrf.mxu0 }
0x1829   :  { %1479 = vlog2.f32 %v1188_v31 }
0x182f   :  { %v1480_v47 = vpop.eup %1479 }
0x1830   :  { %v1194_v54 = vmul.f32 0.6931472, %v1480_v47 }
0x1832   :  { %v1195_v53 = vadd.f32 %v1194_v54, %v1192_v52 }
0x1834   :  { %v1202_v33 = vsel %vm1201_vm10, %v1195_v53, %v1161_v43 }
0x1835   :  { %v1203_v56 = vsel %vm886_vm12, %v1202_v33, -inf }
0x1836   :  { %1204 = vmax.xlane.f32.xlu1 %v1203_v56 }
0x18a9   :  { %v1205_v57 = vpop.xlane.xlu1 %1204 }
0x18aa   :  { %v1206_v20 = vsub.f32 %v1202_v33, %v1205_v57  ;;  %v1232_v17 = vadd.f32 %v1205_v57, %v1976_v46 }
0x18ac   :  { %v1207_v38 = vmul.f32 1.442695, %v1206_v20  ;;  %v1233_v60 = vadd.f32 %v2051_v10, %v1232_v17 }
0x18ae   :  { %1481 = vpow2.f32 %v1207_v38 }
0x18b4   :  { %v1482_v40 = vpop.eup %1481 }
0x18b5   :  { %1381 = vmatmul.msk.f32.vlgmr.msra.gmra.mxu1 %vm886_vm12, %v1482_v40 }
0x1932   :  { %v1229_v50 = vpop.f32.mrf.mxu1 }
0x1933   :  { %1483 = vlog2.f32 %v1229_v50 }
0x1939   :  { %v1484_v58 = vpop.eup %1483 }
0x193a   :  { %v1235_v32 = vmul.f32 0.6931472, %v1484_v58 }
0x193c   :  { %v1236_v61 = vadd.f32 %v1235_v32, %v1233_v60 }
0x193e   :  { %v1243_v26 = vsel %vm1242_vm11, %v1236_v61, %v1202_v33 }
0x193f   :  { %v1244_v62 = vsel %vm886_vm12, %v1243_v26, -inf }
0x1940   :  { %1245 = vmax.xlane.f32.xlu0 %v1244_v62 }
0x19b3   :  { %v1246_v63 = vpop.xlane.xlu0 %1245 }
0x19b4   :  { %v1247_v1 = vsub.f32 %v1243_v26, %v1246_v63  ;;  %v1273_v46 = vadd.f32 %v1246_v63, %v1980_v18 }
0x19b6   :  { %v1248_v37 = vmul.f32 1.442695, %v1247_v1  ;;  %v1274_v12 = vadd.f32 %v2051_v10, %v1273_v46 }
0x19b8   :  { %1485 = vpow2.f32 %v1248_v37 }
0x19be   :  { %v1486_v3 = vpop.eup %1485 }
0x19bf   :  { %1383 = vmatmul.msk.f32.vlgmr.msrb.gmra.mxu0 %vm886_vm12, %v1486_v3 }
0x1a3c   :  { %v1270_v4 = vpop.f32.mrf.mxu0 }
0x1a3d   :  { %1487 = vlog2.f32 %v1270_v4 }
0x1a43   :  { %v1488_v6 = vpop.eup %1487 }
0x1a44   :  { %v1276_v27 = vmul.f32 0.6931472, %v1488_v6 }
0x1a46   :  { %v1277_v51 = vadd.f32 %v1276_v27, %v1274_v12 }
0x1a48   :  { %v1284_v14 = vsel %vm1283_vm6, %v1277_v51, %v1243_v26 }
0x1a49   :  { %v1285_v41 = vadd.f32 %v2040_v5, %v1284_v14  ;;  %v1300_v5 = vshrl.u32 %v165_v23, 7 }
0x1a4b   :  { %v1286_v49 = vsel %vm886_vm12, %v1285_v41, -inf  ;;  %vm1301_vm7 = vcmp.eq.s32.totalorder %v1300_v5, %v1704_v25 }
0x1a4c   :  { %1287 = vmax.xlane.f32.xlu1 %v1286_v49 }
0x1a54   :  { %989 = vadd.xlane.f32.xlu1 %v988_v42 }
0x1abf   :  { %v1288_v13 = vpop.xlane.xlu1 %1287 }
0x1ac0   :  { %v1289_v15 = vsub.f32 %v1285_v41, %v1288_v13 }
0x1ac2   :  { %v1290_v18 = vmul.f32 1.442695, %v1289_v15 }
0x1ac4   :  { %1489 = vpow2.f32 %v1290_v18 }
0x1ac7   :  { %v990_v28 = vpop.xlane.xlu1 %989 }
0x1aca   :  { %v1490_v16 = vpop.eup %1489 }
0x1acb   :  { %v1292_v10 = vsel %vm886_vm12, %v1490_v16, 0.0  ;;  %vm1311_vm12 = vcmask 57344  }
0x1acc   :  { %1293 = vadd.xlane.f32.xlu2 %v1292_v10 }
0x1b3f   :  { %v1294_v19 = vpop.xlane.xlu2 %1293 }
0x1b40   :  { %1491 = vlog2.f32 %v1294_v19 }
0x1b46   :  { %v1492_v39 = vpop.eup %1491 }
0x1b47   :  { %v1296_v21 = vmul.f32 0.6931472, %v1492_v39 }
0x1b49   :  { %v1297_v36 = vadd.f32 %v1296_v21, %v1288_v13 }
0x1b4b   :  { %v1298_v34 = vsub.f32 %v1297_v36, %v990_v28 }
0x1b4d   :  { %v1302_v45 = vsel %vm1301_vm7, %v1298_v34, 0.0 }
0x1b4e   :  { %v1304_v0 = vsel %vm1303_vm0, %v1302_v45, 0.0 }
0x1b4f   :  { %v1305_v2 = vrot.slane %v1304_v0, 4 }
0x1b51   :  { %v1306_v9 = vadd.f32 %v1305_v2, %v1304_v0 }
0x1b53   :  { %v1307_v29 = vrot.slane %v1306_v9, 2 }
0x1b55   :  { %v1308_v55 = vadd.f32 %v1307_v29, %v1306_v9 }
0x1b57   :  { %v1309_v23 = vrot.slane %v1308_v55, 1 }
0x1b59   :  { %v1310_v43 = vadd.f32 %v1309_v23, %v1308_v55 }
0x1b5b   :  { %1312 = vst.msk [vmem:[#allocation3] sm:$0x1] %vm1311_vm12, %v1310_v43 }
0x1b5c   :  { %1323 = dma.vmem_to_hbm [thread:$0]  %s1319_s10, 16, %s1321_s27, [#allocation4]  }
0x1b5d   :  { %1517 = dma.done.wait [#allocation4], 16  }
0x1b5e   :  { %1518 = vsyncadd [#allocation4], 4294967280 }
0x1b5f   :  { %1328 = vsyncpa [#allocation4], 1 }

</bundles_post_ra>
